<compile_context>
chip_gen: v7x
topology: tpu7x:2x2x1
jax: 0.10.0
libtpu: 0.0.40
codegen_flags: <defaults>
</compile_context>

<pallas_src>
import functools

import jax
import jax.numpy as jnp
import numpy as np
from jax.experimental import pallas as pl
from jax.experimental.pallas import tpu as pltpu


# ---------------------------------------------------------------------------
# Kernel 1: conv1 + (conv2 fused with global average pool)  ->  pooled (1, C)
# ---------------------------------------------------------------------------
def _conv_pool_kernel(x_ref, cw1_ref, cb1_ref, cw2_ref, cb2_ref, mask_ref,
                      pooled_ref, patches_ref, *, H, W):
    C = x_ref.shape[1]
    Wp = W + 2
    P = (H + 2) * Wp                      # flattened padded image length

    x = x_ref[0]                          # (C, P): one zero-padded image, spatial on lanes

    # ---- conv1: im2col into VMEM scratch, then ONE MXU matmul (K = 9*C) ----
    # patches[t*C + ci, p] = x[ci, p + shift(t)],  shift(t) = (dy-1)*Wp + (dx-1).
    # Destinations whose source would be out of range are only padded-border
    # outputs (dropped by the pooling masks below); zero-fill them so no stale
    # VMEM bits (possibly NaN) ever reach the MXU / the masked sums.
    for dy in range(3):
        for dx in range(3):
            t = dy * 3 + dx
            s = (dy - 1) * Wp + (dx - 1)
            d0, d1 = max(0, -s), P - max(0, s)
            rows = slice(t * C, (t + 1) * C)
            if d0 > 0:
                patches_ref[rows, 0:d0] = jnp.zeros((C, d0), jnp.float32)
            if d1 < P:
                patches_ref[rows, d1:P] = jnp.zeros((C, P - d1), jnp.float32)
            patches_ref[rows, d0:d1] = x[:, d0 + s:d1 + s]

    y1 = jnp.dot(cw1_ref[...], patches_ref[...],
                 preferred_element_type=jnp.float32)         # (C, P)
    y1 = jnp.maximum(y1 + cb1_ref[...], 0.0)                 # bias + ReLU (inplace in torch)

    # ---- conv2 (stride 2, pad 1) folded into AdaptiveAvgPool2d((1,1)) ----
    # No nonlinearity between conv2 and the pool, so
    #   pooled[co] = sum_{t,ci} cw2[t*C+ci, co] * (sum_p mask[t,p] * y1[ci,p]) + cb2[co]
    # mask[t] selects exactly the interior positions tap t reads over the
    # stride-2 output grid and already carries the 1/(H2*W2) mean factor.
    m = mask_ref[...]                                        # (9, P)
    pooled = jnp.zeros((1, C), jnp.float32)
    for t in range(9):
        s_t = jnp.sum(y1 * m[t:t + 1, :], axis=1, keepdims=True)            # (C, 1)
        pooled = pooled + jnp.sum(cw2_ref[t * C:(t + 1) * C, :] * s_t,
                                  axis=0, keepdims=True)                    # (1, C)
    pooled_ref[0] = pooled + cb2_ref[...]


# ---------------------------------------------------------------------------
# Kernel 2: MLP head over the whole batch (lane-dense activations).
# ---------------------------------------------------------------------------
def _mlp_kernel(pooled_ref, w1_ref, b1_ref, w2_ref, b2_ref, w3_ref, b3_ref,
                w4_ref, b4_ref, w5_ref, b5_ref, out_ref):
    h = jnp.maximum(jnp.dot(pooled_ref[...], w1_ref[...],
                            preferred_element_type=jnp.float32) + b1_ref[...], 0.0)
    h = jnp.maximum(jnp.dot(h, w2_ref[...],
                            preferred_element_type=jnp.float32) + b2_ref[...], 0.0)
    # TODO(synk): the torch module chains Linear(512,256) -> Linear(128,64), a
    # dim mismatch that errors at runtime in torch; we bridge it by feeding the
    # first 128 of the 256 features into the Linear(128,64) layer.
    h = h[:, :128]
    h = jnp.maximum(jnp.dot(h, w3_ref[...],
                            preferred_element_type=jnp.float32) + b3_ref[...], 0.0)
    h = jnp.maximum(jnp.dot(h, w4_ref[...],
                            preferred_element_type=jnp.float32) + b4_ref[...], 0.0)
    out_ref[...] = jnp.dot(h, w5_ref[...],
                           preferred_element_type=jnp.float32) + b5_ref[...]


# ---------------------------------------------------------------------------
# Wrapper
# ---------------------------------------------------------------------------
def _pool_tap_masks(H, W):
    """mask[t, p] = 1/(H2*W2) iff padded position p is an interior pixel read by
    tap t = dy*3+dx of the stride-2 conv anywhere on its output grid."""
    Hp, Wp = H + 2, W + 2
    H2 = (H - 1) // 2 + 1                 # conv2 output size (k=3, stride=2, pad=1)
    W2 = (W - 1) // 2 + 1
    m = np.zeros((9, Hp, Wp), np.float32)
    for dy in range(3):
        for dx in range(3):
            for h2 in range(H2):
                for w2 in range(W2):
                    hp, wp = 2 * h2 + dy, 2 * w2 + dx
                    if 1 <= hp <= H and 1 <= wp <= W:
                        m[dy * 3 + dx, hp, wp] = 1.0
    return (m / np.float32(H2 * W2)).reshape(9, Hp * Wp)


def _full_spec(arr):
    n = arr.ndim
    return pl.BlockSpec(arr.shape, lambda *_: (0,) * n)


def feature_discriminator(x_nchw, params):
    """Forward pass of FeatureDiscriminator(ndim, use3d=False) for NCHW input."""
    B, C, H, W = x_nchw.shape
    P = (H + 2) * (W + 2)

    # Cheap layout prep only (conv1's zero padding + flatten-to-lanes); all
    # conv / pool / MLP arithmetic runs inside the Pallas kernels.
    xp = jnp.pad(x_nchw.astype(jnp.float32), ((0, 0), (0, 0), (1, 1), (1, 1)))
    x_flat = xp.reshape(B, C, P)
    masks = jnp.asarray(_pool_tap_masks(H, W))

    conv_consts = (params["cw1t"], params["cb1"], params["cw2f"], params["cb2"], masks)
    pooled = pl.pallas_call(
        functools.partial(_conv_pool_kernel, H=H, W=W),
        out_shape=jax.ShapeDtypeStruct((B, 1, C), jnp.float32),
        grid=(B,),
        in_specs=[pl.BlockSpec((1, C, P), lambda b: (b, 0, 0))]
                 + [_full_spec(a) for a in conv_consts],
        out_specs=pl.BlockSpec((1, 1, C), lambda b: (b, 0, 0)),
        scratch_shapes=[pltpu.VMEM((9 * C, P), jnp.float32)],
        compiler_params=pltpu.CompilerParams(
            dimension_semantics=("parallel",),
            vmem_limit_bytes=64 * 1024 * 1024),
    )(x_flat, *conv_consts)
    pooled = pooled.reshape(B, C)         # == Flatten() after the (1,1) pool

    mlp_consts = (params["w1"], params["b1"], params["w2"], params["b2"],
                  params["w3"], params["b3"], params["w4"], params["b4"],
                  params["w5"], params["b5"])
    vmem = pl.BlockSpec(memory_space=pltpu.MemorySpace.VMEM)
    out = pl.pallas_call(
        _mlp_kernel,
        out_shape=jax.ShapeDtypeStruct((B, 1), jnp.float32),
        in_specs=[vmem] * (1 + len(mlp_consts)),
        out_specs=vmem,
        compiler_params=pltpu.CompilerParams(vmem_limit_bytes=64 * 1024 * 1024),
    )(pooled, *mlp_consts)
    return out


# ---------------------------------------------------------------------------
# Params (kernel layouts) + pure-JAX reference for the self-check
# ---------------------------------------------------------------------------
def init_params(key, ndim):
    keys = jax.random.split(key, 14)

    def w(k, shape, fan_in):
        return jax.random.normal(k, shape, jnp.float32) / jnp.sqrt(jnp.float32(fan_in))

    C = ndim
    p = {}
    # Conv weights with the (tap = ky*3+kx, cin) axis flattened.  From a torch
    # OIHW Conv2d weight:  cw1t = w.transpose(0,2,3,1).reshape(C, 9*C)
    #                      cw2f = w.transpose(2,3,1,0).reshape(9*C, C)
    p["cw1t"] = w(keys[0], (C, 9 * C), 9 * C)
    p["cb1"] = w(keys[1], (C, 1), C)
    p["cw2f"] = w(keys[2], (9 * C, C), 9 * C)
    p["cb2"] = w(keys[3], (1, C), C)
    # Linear weights stored as (in, out) = torch weight.T; biases as (1, out).
    dims = [(C, 512), (512, 256), (128, 64), (64, 32), (32, 1)]
    for i, (din, dout) in enumerate(dims):
        p[f"w{i + 1}"] = w(keys[4 + 2 * i], (din, dout), din)
        p[f"b{i + 1}"] = w(keys[5 + 2 * i], (1, dout), din)
    return p


def _reference(x, p):
    """Pure-JAX reference mirroring the torch module (use3d=False), including the
    Linear(512,256)->Linear(128,64) bridge via the first 128 features."""
    B, C, H, W = x.shape
    hi = jax.lax.Precision.HIGHEST
    w1 = p["cw1t"].reshape(C, 3, 3, C).transpose(0, 3, 1, 2)      # -> OIHW
    w2 = p["cw2f"].reshape(3, 3, C, C).transpose(3, 2, 0, 1)      # -> OIHW
    dn = ("NCHW", "OIHW", "NCHW")
    y = jax.lax.conv_general_dilated(x, w1, (1, 1), ((1, 1), (1, 1)),
                                     dimension_numbers=dn, precision=hi)
    y = jax.nn.relu(y + p["cb1"].reshape(1, C, 1, 1))
    y = jax.lax.conv_general_dilated(y, w2, (2, 2), ((1, 1), (1, 1)),
                                     dimension_numbers=dn, precision=hi)
    y = y + p["cb2"].reshape(1, C, 1, 1)
    h = jnp.mean(y, axis=(2, 3))                                  # pool + flatten
    h = jax.nn.relu(jnp.dot(h, p["w1"], precision=hi) + p["b1"])
    h = jax.nn.relu(jnp.dot(h, p["w2"], precision=hi) + p["b2"])
    h = h[:, :128]
    h = jax.nn.relu(jnp.dot(h, p["w3"], precision=hi) + p["b3"])
    h = jax.nn.relu(jnp.dot(h, p["w4"], precision=hi) + p["b4"])
    return jnp.dot(h, p["w5"], precision=hi) + p["b5"]


if __name__ == "__main__":
    key = jax.random.PRNGKey(0)
    kx, kp = jax.random.split(key)
    B, C, H, W = 2, 4, 16, 16             # ndim = 4
    x = jax.random.normal(kx, (B, C, H, W), jnp.float32)
    params = init_params(kp, C)

    out = jax.block_until_ready(feature_discriminator(x, params))
    assert out.shape == (B, 1) and out.dtype == jnp.float32

    ref = jax.block_until_ready(_reference(x, params))
    assert np.allclose(np.asarray(out), np.asarray(ref), rtol=2e-3, atol=2e-3), (
        np.asarray(out), np.asarray(ref))
    print("KERNEL_OK")
</pallas_src>

<mosaic_0001>
module attributes {stable_mosaic.version = 11 : i64} {
  func.func @_conv_pool_kernel(%arg0: i32, %arg1: memref<1x4x324xf32, #tpu.memory_space<vmem>>, %arg2: memref<4x36xf32, #tpu.memory_space<vmem>>, %arg3: memref<4x1xf32, #tpu.memory_space<vmem>>, %arg4: memref<36x4xf32, #tpu.memory_space<vmem>>, %arg5: memref<1x4xf32, #tpu.memory_space<vmem>>, %arg6: memref<9x324xf32, #tpu.memory_space<vmem>>, %arg7: memref<1x1x4xf32, #tpu.memory_space<vmem>>, %arg8: memref<36x324xf32, #tpu.memory_space<vmem>>) attributes {dimension_semantics = [#tpu.dimension_semantics<parallel>], iteration_bounds = array<i64: 2>, scalar_prefetch = 0 : i64, scratch_operands = 1 : i64, tpu.core_type = #tpu.core_type<tc>, window_params = [{transform_indices = @transform_0, window_bounds = array<i64: 1, 4, 324>}, {pipeline_mode = #tpu.pipeline_mode<synchronous>, transform_indices = @transform_1, window_bounds = array<i64: 4, 36>}, {pipeline_mode = #tpu.pipeline_mode<synchronous>, transform_indices = @transform_2, window_bounds = array<i64: 4, 1>}, {pipeline_mode = #tpu.pipeline_mode<synchronous>, transform_indices = @transform_3, window_bounds = array<i64: 36, 4>}, {pipeline_mode = #tpu.pipeline_mode<synchronous>, transform_indices = @transform_4, window_bounds = array<i64: 1, 4>}, {pipeline_mode = #tpu.pipeline_mode<synchronous>, transform_indices = @transform_5, window_bounds = array<i64: 9, 324>}, {transform_indices = @transform_6, window_bounds = array<i64: 1, 1, 4>}]} {
    %c0 = arith.constant 0 : index
    %c0_0 = arith.constant 0 : index
    %c0_1 = arith.constant 0 : index
    %0 = vector.load %arg1[%c0, %c0_0, %c0_1] : memref<1x4x324xf32, #tpu.memory_space<vmem>>, vector<1x4x324xf32>
    %1 = vector.shape_cast %0 : vector<1x4x324xf32> to vector<4x324xf32>
    %cst = arith.constant 0.000000e+00 : f32
    %2 = vector.broadcast %cst : f32 to vector<4x19xf32>
    %c0_2 = arith.constant 0 : index
    %c0_3 = arith.constant 0 : index
    %3 = vector.load %arg8[%c0_2, %c0_3] : memref<36x324xf32, #tpu.memory_space<vmem>>, vector<4x19xf32>
    tpu.vector_store %arg8[%c0_2, %c0_3], %2 {strides = array<i32>} : memref<36x324xf32, #tpu.memory_space<vmem>>, vector<4x19xf32>,
    %4 = vector.extract_strided_slice %1 {offsets = [0, 0], sizes = [4, 305], strides = [1, 1]} : vector<4x324xf32> to vector<4x305xf32>
    %c0_4 = arith.constant 0 : index
    %c19 = arith.constant 19 : index
    %5 = vector.load %arg8[%c0_4, %c19] : memref<36x324xf32, #tpu.memory_space<vmem>>, vector<4x305xf32>
    tpu.vector_store %arg8[%c0_4, %c19], %4 {strides = array<i32>} : memref<36x324xf32, #tpu.memory_space<vmem>>, vector<4x305xf32>,
    %cst_5 = arith.constant 0.000000e+00 : f32
    %6 = vector.broadcast %cst_5 : f32 to vector<4x18xf32>
    %c4 = arith.constant 4 : index
    %c0_6 = arith.constant 0 : index
    %7 = vector.load %arg8[%c4, %c0_6] : memref<36x324xf32, #tpu.memory_space<vmem>>, vector<4x18xf32>
    tpu.vector_store %arg8[%c4, %c0_6], %6 {strides = array<i32>} : memref<36x324xf32, #tpu.memory_space<vmem>>, vector<4x18xf32>,
    %8 = vector.extract_strided_slice %1 {offsets = [0, 0], sizes = [4, 306], strides = [1, 1]} : vector<4x324xf32> to vector<4x306xf32>
    %c4_7 = arith.constant 4 : index
    %c18 = arith.constant 18 : index
    %9 = vector.load %arg8[%c4_7, %c18] : memref<36x324xf32, #tpu.memory_space<vmem>>, vector<4x306xf32>
    tpu.vector_store %arg8[%c4_7, %c18], %8 {strides = array<i32>} : memref<36x324xf32, #tpu.memory_space<vmem>>, vector<4x306xf32>,
    %cst_8 = arith.constant 0.000000e+00 : f32
    %10 = vector.broadcast %cst_8 : f32 to vector<4x17xf32>
    %c8 = arith.constant 8 : index
    %c0_9 = arith.constant 0 : index
    %11 = vector.load %arg8[%c8, %c0_9] : memref<36x324xf32, #tpu.memory_space<vmem>>, vector<4x17xf32>
    tpu.vector_store %arg8[%c8, %c0_9], %10 {strides = array<i32>} : memref<36x324xf32, #tpu.memory_space<vmem>>, vector<4x17xf32>,
    %12 = vector.extract_strided_slice %1 {offsets = [0, 0], sizes = [4, 307], strides = [1, 1]} : vector<4x324xf32> to vector<4x307xf32>
    %c8_10 = arith.constant 8 : index
    %c17 = arith.constant 17 : index
    %13 = vector.load %arg8[%c8_10, %c17] : memref<36x324xf32, #tpu.memory_space<vmem>>, vector<4x307xf32>
    tpu.vector_store %arg8[%c8_10, %c17], %12 {strides = array<i32>} : memref<36x324xf32, #tpu.memory_space<vmem>>, vector<4x307xf32>,
    %cst_11 = arith.constant 0.000000e+00 : f32
    %14 = vector.broadcast %cst_11 : f32 to vector<4x1xf32>
    %c12 = arith.constant 12 : index
    %c0_12 = arith.constant 0 : index
    %15 = vector.load %arg8[%c12, %c0_12] : memref<36x324xf32, #tpu.memory_space<vmem>>, vector<4x1xf32>
    tpu.vector_store %arg8[%c12, %c0_12], %14 {strides = array<i32>} : memref<36x324xf32, #tpu.memory_space<vmem>>, vector<4x1xf32>,
    %16 = vector.extract_strided_slice %1 {offsets = [0, 0], sizes = [4, 323], strides = [1, 1]} : vector<4x324xf32> to vector<4x323xf32>
    %c12_13 = arith.constant 12 : index
    %c1 = arith.constant 1 : index
    %17 = vector.load %arg8[%c12_13, %c1] : memref<36x324xf32, #tpu.memory_space<vmem>>, vector<4x323xf32>
    tpu.vector_store %arg8[%c12_13, %c1], %16 {strides = array<i32>} : memref<36x324xf32, #tpu.memory_space<vmem>>, vector<4x323xf32>,
    %c16 = arith.constant 16 : index
    %c0_14 = arith.constant 0 : index
    %18 = vector.load %arg8[%c16, %c0_14] : memref<36x324xf32, #tpu.memory_space<vmem>>, vector<4x324xf32>
    tpu.vector_store %arg8[%c16, %c0_14], %1 {strides = array<i32>} : memref<36x324xf32, #tpu.memory_space<vmem>>, vector<4x324xf32>,
    %cst_15 = arith.constant 0.000000e+00 : f32
    %19 = vector.broadcast %cst_15 : f32 to vector<4x1xf32>
    %c20 = arith.constant 20 : index
    %c323 = arith.constant 323 : index
    %20 = vector.load %arg8[%c20, %c323] : memref<36x324xf32, #tpu.memory_space<vmem>>, vector<4x1xf32>
    tpu.vector_store %arg8[%c20, %c323], %19 {strides = array<i32>} : memref<36x324xf32, #tpu.memory_space<vmem>>, vector<4x1xf32>,
    %21 = vector.extract_strided_slice %1 {offsets = [0, 1], sizes = [4, 323], strides = [1, 1]} : vector<4x324xf32> to vector<4x323xf32>
    %c20_16 = arith.constant 20 : index
    %c0_17 = arith.constant 0 : index
    %22 = vector.load %arg8[%c20_16, %c0_17] : memref<36x324xf32, #tpu.memory_space<vmem>>, vector<4x323xf32>
    tpu.vector_store %arg8[%c20_16, %c0_17], %21 {strides = array<i32>} : memref<36x324xf32, #tpu.memory_space<vmem>>, vector<4x323xf32>,
    %cst_18 = arith.constant 0.000000e+00 : f32
    %23 = vector.broadcast %cst_18 : f32 to vector<4x17xf32>
    %c24 = arith.constant 24 : index
    %c307 = arith.constant 307 : index
    %24 = vector.load %arg8[%c24, %c307] : memref<36x324xf32, #tpu.memory_space<vmem>>, vector<4x17xf32>
    tpu.vector_store %arg8[%c24, %c307], %23 {strides = array<i32>} : memref<36x324xf32, #tpu.memory_space<vmem>>, vector<4x17xf32>,
    %25 = vector.extract_strided_slice %1 {offsets = [0, 17], sizes = [4, 307], strides = [1, 1]} : vector<4x324xf32> to vector<4x307xf32>
    %c24_19 = arith.constant 24 : index
    %c0_20 = arith.constant 0 : index
    %26 = vector.load %arg8[%c24_19, %c0_20] : memref<36x324xf32, #tpu.memory_space<vmem>>, vector<4x307xf32>
    tpu.vector_store %arg8[%c24_19, %c0_20], %25 {strides = array<i32>} : memref<36x324xf32, #tpu.memory_space<vmem>>, vector<4x307xf32>,
    %cst_21 = arith.constant 0.000000e+00 : f32
    %27 = vector.broadcast %cst_21 : f32 to vector<4x18xf32>
    %c28 = arith.constant 28 : index
    %c306 = arith.constant 306 : index
    %28 = vector.load %arg8[%c28, %c306] : memref<36x324xf32, #tpu.memory_space<vmem>>, vector<4x18xf32>
    tpu.vector_store %arg8[%c28, %c306], %27 {strides = array<i32>} : memref<36x324xf32, #tpu.memory_space<vmem>>, vector<4x18xf32>,
    %29 = vector.extract_strided_slice %1 {offsets = [0, 18], sizes = [4, 306], strides = [1, 1]} : vector<4x324xf32> to vector<4x306xf32>
    %c28_22 = arith.constant 28 : index
    %c0_23 = arith.constant 0 : index
    %30 = vector.load %arg8[%c28_22, %c0_23] : memref<36x324xf32, #tpu.memory_space<vmem>>, vector<4x306xf32>
    tpu.vector_store %arg8[%c28_22, %c0_23], %29 {strides = array<i32>} : memref<36x324xf32, #tpu.memory_space<vmem>>, vector<4x306xf32>,
    %cst_24 = arith.constant 0.000000e+00 : f32
    %31 = vector.broadcast %cst_24 : f32 to vector<4x19xf32>
    %c32 = arith.constant 32 : index
    %c305 = arith.constant 305 : index
    %32 = vector.load %arg8[%c32, %c305] : memref<36x324xf32, #tpu.memory_space<vmem>>, vector<4x19xf32>
    tpu.vector_store %arg8[%c32, %c305], %31 {strides = array<i32>} : memref<36x324xf32, #tpu.memory_space<vmem>>, vector<4x19xf32>,
    %33 = vector.extract_strided_slice %1 {offsets = [0, 19], sizes = [4, 305], strides = [1, 1]} : vector<4x324xf32> to vector<4x305xf32>
    %c32_25 = arith.constant 32 : index
    %c0_26 = arith.constant 0 : index
    %34 = vector.load %arg8[%c32_25, %c0_26] : memref<36x324xf32, #tpu.memory_space<vmem>>, vector<4x305xf32>
    tpu.vector_store %arg8[%c32_25, %c0_26], %33 {strides = array<i32>} : memref<36x324xf32, #tpu.memory_space<vmem>>, vector<4x305xf32>,
    %c0_27 = arith.constant 0 : index
    %c0_28 = arith.constant 0 : index
    %35 = vector.load %arg2[%c0_27, %c0_28] : memref<4x36xf32, #tpu.memory_space<vmem>>, vector<4x36xf32>
    %c0_29 = arith.constant 0 : index
    %c0_30 = arith.constant 0 : index
    %36 = vector.load %arg8[%c0_29, %c0_30] : memref<36x324xf32, #tpu.memory_space<vmem>>, vector<36x324xf32>
    %cst_31 = arith.constant dense<0.000000e+00> : vector<4x324xf32>
    %37 = tpu.matmul %35, %36, %cst_31 {dimension_numbers = #tpu.dot_dimension_numbers<[1], [0], [0], [1], [0, 0, 1, 1], [], []>} : vector<4x36xf32>, vector<36x324xf32>, vector<4x324xf32> -> vector<4x324xf32>
    %c0_32 = arith.constant 0 : index
    %c0_33 = arith.constant 0 : index
    %38 = vector.load %arg3[%c0_32, %c0_33] : memref<4x1xf32, #tpu.memory_space<vmem>>, vector<4x1xf32>
    %39 = vector.broadcast %38 : vector<4x1xf32> to vector<4x324xf32>
    %40 = arith.addf %37, %39 : vector<4x324xf32>
    %cst_34 = arith.constant 0.000000e+00 : f32
    %41 = vector.broadcast %cst_34 : f32 to vector<4x324xf32>
    %42 = arith.maximumf %40, %41 : vector<4x324xf32>
    %c0_35 = arith.constant 0 : index
    %c0_36 = arith.constant 0 : index
    %43 = vector.load %arg6[%c0_35, %c0_36] : memref<9x324xf32, #tpu.memory_space<vmem>>, vector<9x324xf32>
    %cst_37 = arith.constant 0.000000e+00 : f32
    %44 = vector.broadcast %cst_37 : f32 to vector<1x4xf32>
    %45 = vector.extract_strided_slice %43 {offsets = [0, 0], sizes = [1, 324], strides = [1, 1]} : vector<9x324xf32> to vector<1x324xf32>
    %46 = vector.broadcast %45 : vector<1x324xf32> to vector<4x324xf32>
    %47 = arith.mulf %42, %46 : vector<4x324xf32>
    %cst_38 = arith.constant dense<0.000000e+00> : vector<4xf32>
    %48 = vector.multi_reduction <add>, %47, %cst_38 [1] : vector<4x324xf32> to vector<4xf32>
    %49 = vector.shape_cast %48 : vector<4xf32> to vector<4x1xf32>
    %c0_39 = arith.constant 0 : index
    %c0_40 = arith.constant 0 : index
    %50 = vector.load %arg4[%c0_39, %c0_40] : memref<36x4xf32, #tpu.memory_space<vmem>>, vector<4x4xf32>
    %51 = vector.broadcast %49 : vector<4x1xf32> to vector<4x4xf32>
    %52 = arith.mulf %50, %51 : vector<4x4xf32>
    %cst_41 = arith.constant dense<0.000000e+00> : vector<4xf32>
    %53 = vector.multi_reduction <add>, %52, %cst_41 [0] : vector<4x4xf32> to vector<4xf32>
    %54 = vector.shape_cast %53 : vector<4xf32> to vector<1x4xf32>
    %55 = arith.addf %44, %54 : vector<1x4xf32>
    %56 = vector.extract_strided_slice %43 {offsets = [1, 0], sizes = [1, 324], strides = [1, 1]} : vector<9x324xf32> to vector<1x324xf32>
    %57 = vector.broadcast %56 : vector<1x324xf32> to vector<4x324xf32>
    %58 = arith.mulf %42, %57 : vector<4x324xf32>
    %cst_42 = arith.constant dense<0.000000e+00> : vector<4xf32>
    %59 = vector.multi_reduction <add>, %58, %cst_42 [1] : vector<4x324xf32> to vector<4xf32>
    %60 = vector.shape_cast %59 : vector<4xf32> to vector<4x1xf32>
    %c4_43 = arith.constant 4 : index
    %c0_44 = arith.constant 0 : index
    %61 = vector.load %arg4[%c4_43, %c0_44] : memref<36x4xf32, #tpu.memory_space<vmem>>, vector<4x4xf32>
    %62 = vector.broadcast %60 : vector<4x1xf32> to vector<4x4xf32>
    %63 = arith.mulf %61, %62 : vector<4x4xf32>
    %cst_45 = arith.constant dense<0.000000e+00> : vector<4xf32>
    %64 = vector.multi_reduction <add>, %63, %cst_45 [0] : vector<4x4xf32> to vector<4xf32>
    %65 = vector.shape_cast %64 : vector<4xf32> to vector<1x4xf32>
    %66 = arith.addf %55, %65 : vector<1x4xf32>
    %67 = vector.extract_strided_slice %43 {offsets = [2, 0], sizes = [1, 324], strides = [1, 1]} : vector<9x324xf32> to vector<1x324xf32>
    %68 = vector.broadcast %67 : vector<1x324xf32> to vector<4x324xf32>
    %69 = arith.mulf %42, %68 : vector<4x324xf32>
    %cst_46 = arith.constant dense<0.000000e+00> : vector<4xf32>
    %70 = vector.multi_reduction <add>, %69, %cst_46 [1] : vector<4x324xf32> to vector<4xf32>
    %71 = vector.shape_cast %70 : vector<4xf32> to vector<4x1xf32>
    %c8_47 = arith.constant 8 : index
    %c0_48 = arith.constant 0 : index
    %72 = vector.load %arg4[%c8_47, %c0_48] : memref<36x4xf32, #tpu.memory_space<vmem>>, vector<4x4xf32>
    %73 = vector.broadcast %71 : vector<4x1xf32> to vector<4x4xf32>
    %74 = arith.mulf %72, %73 : vector<4x4xf32>
    %cst_49 = arith.constant dense<0.000000e+00> : vector<4xf32>
    %75 = vector.multi_reduction <add>, %74, %cst_49 [0] : vector<4x4xf32> to vector<4xf32>
    %76 = vector.shape_cast %75 : vector<4xf32> to vector<1x4xf32>
    %77 = arith.addf %66, %76 : vector<1x4xf32>
    %78 = vector.extract_strided_slice %43 {offsets = [3, 0], sizes = [1, 324], strides = [1, 1]} : vector<9x324xf32> to vector<1x324xf32>
    %79 = vector.broadcast %78 : vector<1x324xf32> to vector<4x324xf32>
    %80 = arith.mulf %42, %79 : vector<4x324xf32>
    %cst_50 = arith.constant dense<0.000000e+00> : vector<4xf32>
    %81 = vector.multi_reduction <add>, %80, %cst_50 [1] : vector<4x324xf32> to vector<4xf32>
    %82 = vector.shape_cast %81 : vector<4xf32> to vector<4x1xf32>
    %c12_51 = arith.constant 12 : index
    %c0_52 = arith.constant 0 : index
    %83 = vector.load %arg4[%c12_51, %c0_52] : memref<36x4xf32, #tpu.memory_space<vmem>>, vector<4x4xf32>
    %84 = vector.broadcast %82 : vector<4x1xf32> to vector<4x4xf32>
    %85 = arith.mulf %83, %84 : vector<4x4xf32>
    %cst_53 = arith.constant dense<0.000000e+00> : vector<4xf32>
    %86 = vector.multi_reduction <add>, %85, %cst_53 [0] : vector<4x4xf32> to vector<4xf32>
    %87 = vector.shape_cast %86 : vector<4xf32> to vector<1x4xf32>
    %88 = arith.addf %77, %87 : vector<1x4xf32>
    %89 = vector.extract_strided_slice %43 {offsets = [4, 0], sizes = [1, 324], strides = [1, 1]} : vector<9x324xf32> to vector<1x324xf32>
    %90 = vector.broadcast %89 : vector<1x324xf32> to vector<4x324xf32>
    %91 = arith.mulf %42, %90 : vector<4x324xf32>
    %cst_54 = arith.constant dense<0.000000e+00> : vector<4xf32>
    %92 = vector.multi_reduction <add>, %91, %cst_54 [1] : vector<4x324xf32> to vector<4xf32>
    %93 = vector.shape_cast %92 : vector<4xf32> to vector<4x1xf32>
    %c16_55 = arith.constant 16 : index
    %c0_56 = arith.constant 0 : index
    %94 = vector.load %arg4[%c16_55, %c0_56] : memref<36x4xf32, #tpu.memory_space<vmem>>, vector<4x4xf32>
    %95 = vector.broadcast %93 : vector<4x1xf32> to vector<4x4xf32>
    %96 = arith.mulf %94, %95 : vector<4x4xf32>
    %cst_57 = arith.constant dense<0.000000e+00> : vector<4xf32>
    %97 = vector.multi_reduction <add>, %96, %cst_57 [0] : vector<4x4xf32> to vector<4xf32>
    %98 = vector.shape_cast %97 : vector<4xf32> to vector<1x4xf32>
    %99 = arith.addf %88, %98 : vector<1x4xf32>
    %100 = vector.extract_strided_slice %43 {offsets = [5, 0], sizes = [1, 324], strides = [1, 1]} : vector<9x324xf32> to vector<1x324xf32>
    %101 = vector.broadcast %100 : vector<1x324xf32> to vector<4x324xf32>
    %102 = arith.mulf %42, %101 : vector<4x324xf32>
    %cst_58 = arith.constant dense<0.000000e+00> : vector<4xf32>
    %103 = vector.multi_reduction <add>, %102, %cst_58 [1] : vector<4x324xf32> to vector<4xf32>
    %104 = vector.shape_cast %103 : vector<4xf32> to vector<4x1xf32>
    %c20_59 = arith.constant 20 : index
    %c0_60 = arith.constant 0 : index
    %105 = vector.load %arg4[%c20_59, %c0_60] : memref<36x4xf32, #tpu.memory_space<vmem>>, vector<4x4xf32>
    %106 = vector.broadcast %104 : vector<4x1xf32> to vector<4x4xf32>
    %107 = arith.mulf %105, %106 : vector<4x4xf32>
    %cst_61 = arith.constant dense<0.000000e+00> : vector<4xf32>
    %108 = vector.multi_reduction <add>, %107, %cst_61 [0] : vector<4x4xf32> to vector<4xf32>
    %109 = vector.shape_cast %108 : vector<4xf32> to vector<1x4xf32>
    %110 = arith.addf %99, %109 : vector<1x4xf32>
    %111 = vector.extract_strided_slice %43 {offsets = [6, 0], sizes = [1, 324], strides = [1, 1]} : vector<9x324xf32> to vector<1x324xf32>
    %112 = vector.broadcast %111 : vector<1x324xf32> to vector<4x324xf32>
    %113 = arith.mulf %42, %112 : vector<4x324xf32>
    %cst_62 = arith.constant dense<0.000000e+00> : vector<4xf32>
    %114 = vector.multi_reduction <add>, %113, %cst_62 [1] : vector<4x324xf32> to vector<4xf32>
    %115 = vector.shape_cast %114 : vector<4xf32> to vector<4x1xf32>
    %c24_63 = arith.constant 24 : index
    %c0_64 = arith.constant 0 : index
    %116 = vector.load %arg4[%c24_63, %c0_64] : memref<36x4xf32, #tpu.memory_space<vmem>>, vector<4x4xf32>
    %117 = vector.broadcast %115 : vector<4x1xf32> to vector<4x4xf32>
    %118 = arith.mulf %116, %117 : vector<4x4xf32>
    %cst_65 = arith.constant dense<0.000000e+00> : vector<4xf32>
    %119 = vector.multi_reduction <add>, %118, %cst_65 [0] : vector<4x4xf32> to vector<4xf32>
    %120 = vector.shape_cast %119 : vector<4xf32> to vector<1x4xf32>
    %121 = arith.addf %110, %120 : vector<1x4xf32>
    %122 = vector.extract_strided_slice %43 {offsets = [7, 0], sizes = [1, 324], strides = [1, 1]} : vector<9x324xf32> to vector<1x324xf32>
    %123 = vector.broadcast %122 : vector<1x324xf32> to vector<4x324xf32>
    %124 = arith.mulf %42, %123 : vector<4x324xf32>
    %cst_66 = arith.constant dense<0.000000e+00> : vector<4xf32>
    %125 = vector.multi_reduction <add>, %124, %cst_66 [1] : vector<4x324xf32> to vector<4xf32>
    %126 = vector.shape_cast %125 : vector<4xf32> to vector<4x1xf32>
    %c28_67 = arith.constant 28 : index
    %c0_68 = arith.constant 0 : index
    %127 = vector.load %arg4[%c28_67, %c0_68] : memref<36x4xf32, #tpu.memory_space<vmem>>, vector<4x4xf32>
    %128 = vector.broadcast %126 : vector<4x1xf32> to vector<4x4xf32>
    %129 = arith.mulf %127, %128 : vector<4x4xf32>
    %cst_69 = arith.constant dense<0.000000e+00> : vector<4xf32>
    %130 = vector.multi_reduction <add>, %129, %cst_69 [0] : vector<4x4xf32> to vector<4xf32>
    %131 = vector.shape_cast %130 : vector<4xf32> to vector<1x4xf32>
    %132 = arith.addf %121, %131 : vector<1x4xf32>
    %133 = vector.extract_strided_slice %43 {offsets = [8, 0], sizes = [1, 324], strides = [1, 1]} : vector<9x324xf32> to vector<1x324xf32>
    %134 = vector.broadcast %133 : vector<1x324xf32> to vector<4x324xf32>
    %135 = arith.mulf %42, %134 : vector<4x324xf32>
    %cst_70 = arith.constant dense<0.000000e+00> : vector<4xf32>
    %136 = vector.multi_reduction <add>, %135, %cst_70 [1] : vector<4x324xf32> to vector<4xf32>
    %137 = vector.shape_cast %136 : vector<4xf32> to vector<4x1xf32>
    %c32_71 = arith.constant 32 : index
    %c0_72 = arith.constant 0 : index
    %138 = vector.load %arg4[%c32_71, %c0_72] : memref<36x4xf32, #tpu.memory_space<vmem>>, vector<4x4xf32>
    %139 = vector.broadcast %137 : vector<4x1xf32> to vector<4x4xf32>
    %140 = arith.mulf %138, %139 : vector<4x4xf32>
    %cst_73 = arith.constant dense<0.000000e+00> : vector<4xf32>
    %141 = vector.multi_reduction <add>, %140, %cst_73 [0] : vector<4x4xf32> to vector<4xf32>
    %142 = vector.shape_cast %141 : vector<4xf32> to vector<1x4xf32>
    %143 = arith.addf %132, %142 : vector<1x4xf32>
    %c0_74 = arith.constant 0 : index
    %c0_75 = arith.constant 0 : index
    %144 = vector.load %arg5[%c0_74, %c0_75] : memref<1x4xf32, #tpu.memory_space<vmem>>, vector<1x4xf32>
    %145 = arith.addf %143, %144 : vector<1x4xf32>
    %c0_76 = arith.constant 0 : index
    %c0_77 = arith.constant 0 : index
    %c0_78 = arith.constant 0 : index
    %146 = vector.load %arg7[%c0_76, %c0_77, %c0_78] : memref<1x1x4xf32, #tpu.memory_space<vmem>>, vector<1x1x4xf32>
    %147 = vector.shape_cast %146 : vector<1x1x4xf32> to vector<1x4xf32>
    %148 = vector.shape_cast %145 : vector<1x4xf32> to vector<1x1x4xf32>
    tpu.vector_store %arg7[%c0_76, %c0_77, %c0_78], %148 {strides = array<i32>} : memref<1x1x4xf32, #tpu.memory_space<vmem>>, vector<1x1x4xf32>,
    return
  }
  func.func @transform_0(%arg0: i32) -> (i32, i32, i32) {
    %c0_i32 = arith.constant 0 : i32
    %c0_i32_0 = arith.constant 0 : i32
    %c0_i32_1 = arith.constant 0 : i32
    return %arg0, %c0_i32, %c0_i32_0 : i32, i32, i32
  }
  func.func @transform_1(%arg0: i32) -> (i32, i32) {
    %c0_i32 = arith.constant 0 : i32
    %c0_i32_0 = arith.constant 0 : i32
    %c0_i32_1 = arith.constant 0 : i32
    return %c0_i32, %c0_i32_0 : i32, i32
  }
  func.func @transform_2(%arg0: i32) -> (i32, i32) {
    %c0_i32 = arith.constant 0 : i32
    %c0_i32_0 = arith.constant 0 : i32
    %c0_i32_1 = arith.constant 0 : i32
    return %c0_i32, %c0_i32_0 : i32, i32
  }
  func.func @transform_3(%arg0: i32) -> (i32, i32) {
    %c0_i32 = arith.constant 0 : i32
    %c0_i32_0 = arith.constant 0 : i32
    %c0_i32_1 = arith.constant 0 : i32
    return %c0_i32, %c0_i32_0 : i32, i32
  }
  func.func @transform_4(%arg0: i32) -> (i32, i32) {
    %c0_i32 = arith.constant 0 : i32
    %c0_i32_0 = arith.constant 0 : i32
    %c0_i32_1 = arith.constant 0 : i32
    return %c0_i32, %c0_i32_0 : i32, i32
  }
  func.func @transform_5(%arg0: i32) -> (i32, i32) {
    %c0_i32 = arith.constant 0 : i32
    %c0_i32_0 = arith.constant 0 : i32
    %c0_i32_1 = arith.constant 0 : i32
    return %c0_i32, %c0_i32_0 : i32, i32
  }
  func.func @transform_6(%arg0: i32) -> (i32, i32, i32) {
    %c0_i32 = arith.constant 0 : i32
    %c0_i32_0 = arith.constant 0 : i32
    %c0_i32_1 = arith.constant 0 : i32
    return %arg0, %c0_i32, %c0_i32_0 : i32, i32, i32
  }
}

</mosaic_0001>

<bundles_post_ra>
// kernel: tpu_custom_call.1
= control target key start
LH: loop header
LB: loop body
LE: loop exit
PB: predicated region body
PF: predicated region fallthrough
CT: control target
= control target key end

     0   :  { %11 = vsyncpa [#allocation4], 0  ;;  %s2021_s0 = inlined_call_operand.hbm [shape: f32[2,4,324], index: 0, kind: input, shape index: {}]   ;;  %s2022_s1 = inlined_call_operand.hbm [shape: f32[4,36], index: 1, kind: input, shape index: {}]   ;;  %s2023_s2 = inlined_call_operand.hbm [shape: f32[4,1], index: 2, kind: input, shape index: {}]   ;;  %s2024_s3 = inlined_call_operand.hbm [shape: f32[36,4], index: 3, kind: input, shape index: {}]   ;;  %s2025_s4 = inlined_call_operand.hbm [shape: f32[1,4], index: 4, kind: input, shape index: {}]   ;;  %s2026_s5 = inlined_call_operand.hbm [shape: f32[9,324], index: 5, kind: input, shape index: {}]   ;;  %s2027_s6 = inlined_call_operand.hbm [shape: f32[2,1,4], index: 6, kind: output, shape index: {}]  }
   0x1   :  { %13 = vsyncpa [#allocation4 + $0x1], 0 }
   0x2   :  { %14 = vsyncpa [#allocation7], 0 }
   0x3   :  { %15 = vsyncpa [#allocation10], 0 }
   0x4   :  { %16 = vsyncpa [#allocation13], 0 }
   0x5   :  { %17 = vsyncpa [#allocation5], 0 }
   0x6   :  { %19 = vsyncpa [#allocation5 + $0x1], 0  ;;  %s1584_s21 = smov 0   ;;  %s1586_s22 = smov 0  }
   0x7   :  { %s1588_s23 = smov 0   ;;  %s1590_s24 = smov 0  }
   0x8 LB: > { %s1526_s25 = smov [#allocation6]   ;;  %s1605_s27 = sadd.s32 4294967295, %s1524_s24   ;;  %s1524_s24 = sphi %s1590_s24, %s2052_s24   ;;  %s1520_s23 = sphi %s1588_s23, %s2051_s23   ;;  %s1516_s22 = sphi %s1586_s22, %s2050_s22   ;;  %s1512_s21 = sphi %s1584_s21, %s2049_s21  }
   0x9   : > { %s200_s26 = sshll.u32 %s1526_s25, 4  ;;  %p1098_p0 = scmp.ge.s32.totalorder %s1524_s24, 1  ;;  %s201_s26 = int_to_ptr.vmem [resolvable:$true] %s200_s26 }
   0xa   : > { %p2028_p1 = scmp.eq.s32.totalorder %s1605_s27, 0  ;;  %p187_p2 = scmp.lt.s32.totalorder %s1524_s24, 3 }
   0xb   : > { %s1527_s29 = smov [#allocation9]   ;;  %s1528_s8 = smov [#allocation8]  }
   0xc   : > { %p1610_p3 = pnand %p1098_p0, %p187_p2  ;;  %s221_s30 = sshll.u32 %s1527_s29, 4  ;;  %s1617_s30 = int_to_ptr.vmem [resolvable:$true] %s221_s30 }
   0xd   : > { %s211_s9 = sshll.u32 %s1528_s8, 4  ;;  %s1276_s12 = scalar_lea.hbm %s2022_s1, 64  ;;  %s1625_s9 = int_to_ptr.vmem [resolvable:$true] %s211_s9 }
   0xe   : > { %s2031_s28 = scalar_select %p1610_p3, 1, 0 }
   0xf   : > { %p1183_p5 = pneg %p1610_p3  ;;  %p1277_p7 = scmp.ne.s32.totalorder %s2022_s1, %s1276_s12 }
  0x10   : > { %p1283_p11 = scmp.lt.u32.totalorder %s1276_s12, %s2022_s1 }
  0x11   : > { %p1621_p6 = pnand %p1183_p5, %p2028_p1 }
  0x13   : > { %p1635_p8 = pneg %p1621_p6 }
  0x15   : > { %p1279_p9 = pnand %p1635_p8, %p1277_p7 }
  0x17   : > { %p1280_p10 = pneg %p1279_p9 }
  0x19   : > { %p1285_p12 = pnand %p1283_p11, %p1280_p10 }
  0x1b   : > { %1288 = shalt.err (!%p1285_p12)
}
  0x1c   : > { %s1289_s18 = scalar_lea.vmem %s201_s26, 64  ;;  %p1297_p5 = scmp.lt.s32.totalorder %s201_s26, %s201_s26 }
  0x1d   : > { %p1290_p13 = scmp.ne.s32.totalorder %s201_s26, %s1289_s18  ;;  %p1298_p4 = scmp.lt.s32.totalorder %s1289_s18, %s1289_s18 }
  0x1f   : > { %p1292_p0 = pnand %p1290_p13, %p1635_p8  ;;  %p1299_p1 = por %p1298_p4, %p1297_p5 }
  0x21   : > { %p1293_p2 = pneg %p1292_p0 }
  0x23   : > { %p1300_p3 = pnand %p1299_p1, %p1293_p2 }
  0x25   : > { %1303 = shalt.err (!%p1300_p3)
}
  0x26   : > { %1186 = dma.hbm_to_vmem [thread:$0]  (!%p1621_p6), %s2022_s1, 64, %s201_s26, [#allocation7]  }
  0x27   : > { %s1304_s8 = scalar_lea.hbm %s2024_s3, 640 }
  0x28   : > { %p1305_p7 = scmp.ne.s32.totalorder %s2024_s3, %s1304_s8  ;;  %p1311_p1 = scmp.lt.u32.totalorder %s1304_s8, %s2024_s3 }
  0x2a   : > { %p1307_p9 = pnand %p1305_p7, %p1635_p8 }
  0x2c   : > { %p1308_p4 = pneg %p1307_p9 }
  0x2e   : > { %p1313_p3 = pnand %p1311_p1, %p1308_p4 }
  0x30   : > { %1316 = shalt.err (!%p1313_p3)
}
  0x31   : > { %s1317_s26 = scalar_lea.vmem %s1617_s30, 640  ;;  %p1325_p13 = scmp.lt.s32.totalorder %s1617_s30, %s1617_s30 }
  0x32   : > { %p1318_p10 = scmp.ne.s32.totalorder %s1617_s30, %s1317_s26  ;;  %p1326_p0 = scmp.lt.s32.totalorder %s1317_s26, %s1317_s26 }
  0x34   : > { %p1320_p11 = pnand %p1318_p10, %p1635_p8  ;;  %p1327_p2 = por %p1326_p0, %p1325_p13 }
  0x36   : > { %p1321_p12 = pneg %p1320_p11 }
  0x38   : > { %p1328_p5 = pnand %p1327_p2, %p1321_p12 }
  0x3a   : > { %1331 = shalt.err (!%p1328_p5)
}
  0x3b   : > { %s1529_s14 = smov 128   ;;  %s1530_s16 = smov 8  }
  0x3c   : > { %1192 = dma.hbm_to_vmem [thread:$0]  (!%p1621_p6), %s2024_s3, 640, %s1617_s30, [#allocation10], %s1529_s14, %s1529_s14, %s1530_s16  }
  0x3d   : > { %s1332_s25 = scalar_lea.hbm %s2023_s2, 64 }
  0x3e   : > { %p1333_p7 = scmp.ne.s32.totalorder %s2023_s2, %s1332_s25  ;;  %p1339_p1 = scmp.lt.u32.totalorder %s1332_s25, %s2023_s2 }
  0x40   : > { %p1335_p9 = pnand %p1333_p7, %p1635_p8 }
  0x42   : > { %p1336_p4 = pneg %p1335_p9 }
  0x44   : > { %p1341_p3 = pnand %p1339_p1, %p1336_p4 }
  0x46   : > { %1344 = shalt.err (!%p1341_p3)
}
  0x47   : > { %s1345_s30 = scalar_lea.vmem %s1625_s9, 64  ;;  %p1353_p13 = scmp.lt.s32.totalorder %s1625_s9, %s1625_s9 }
  0x48   : > { %p1346_p10 = scmp.ne.s32.totalorder %s1625_s9, %s1345_s30  ;;  %p1354_p0 = scmp.lt.s32.totalorder %s1345_s30, %s1345_s30 }
  0x4a   : > { %p1348_p11 = pnand %p1346_p10, %p1635_p8  ;;  %p1355_p2 = por %p1354_p0, %p1353_p13 }
  0x4c   : > { %p1349_p12 = pneg %p1348_p11 }
  0x4e   : > { %p1356_p5 = pnand %p1355_p2, %p1349_p12 }
  0x50   : > { %1359 = shalt.err (!%p1356_p5)
}
  0x51   : > { %1189 = dma.hbm_to_vmem [thread:$0]  (!%p1621_p6), %s2023_s2, 64, %s1625_s9, [#allocation7]  }
  0x52   : > { %s1531_s26 = smov [#allocation11]   ;;  %s1532_s16 = smov [#allocation12]  }
  0x53   : > { %s235_s14 = sshll.u32 %s1531_s26, 4  ;;  %s245_s17 = sshll.u32 %s1532_s16, 4  ;;  %s236_s14 = int_to_ptr.vmem [resolvable:$true] %s235_s14  ;;  %s246_s17 = int_to_ptr.vmem [resolvable:$true] %s245_s17 }
  0x54   : > { %s1360_s20 = scalar_lea.hbm %s2025_s4, 16 }
  0x55   : > { %p1361_p7 = scmp.ne.s32.totalorder %s2025_s4, %s1360_s20  ;;  %p1367_p1 = scmp.lt.u32.totalorder %s1360_s20, %s2025_s4 }
  0x57   : > { %p1363_p9 = pnand %p1361_p7, %p1635_p8 }
  0x59   : > { %p1364_p4 = pneg %p1363_p9 }
  0x5b   : > { %p1369_p3 = pnand %p1367_p1, %p1364_p4 }
  0x5d   : > { %1372 = shalt.err (!%p1369_p3)
}
  0x5e   : > { %s1373_s9 = scalar_lea.vmem %s236_s14, 16  ;;  %s1380_s11 = scalar_lea.vmem %s236_s14, 32 }
  0x5f   : > { %p1374_p10 = scmp.ne.s32.totalorder %s236_s14, %s1373_s9  ;;  %p1381_p13 = scmp.lt.s32.totalorder %s236_s14, %s236_s14 }
  0x60   : > { %p1382_p0 = scmp.lt.s32.totalorder %s1380_s11, %s1373_s9 }
  0x61   : > { %p1376_p11 = pnand %p1374_p10, %p1635_p8 }
  0x62   : > { %p1383_p2 = por %p1382_p0, %p1381_p13 }
  0x63   : > { %p1377_p12 = pneg %p1376_p11 }
  0x65   : > { %p1384_p5 = pnand %p1383_p2, %p1377_p12 }
  0x67   : > { %1387 = shalt.err (!%p1384_p5)
}
  0x68   : > { %1195 = dma.hbm_to_vmem [thread:$0]  (!%p1621_p6), %s2025_s4, 16, %s236_s14, [#allocation10]  }
  0x69   : > { %s1388_s16 = scalar_lea.hbm %s2026_s5, 768 }
  0x6a   : > { %p1389_p7 = scmp.ne.s32.totalorder %s2026_s5, %s1388_s16  ;;  %p1395_p1 = scmp.lt.u32.totalorder %s1388_s16, %s2026_s5 }
  0x6c   : > { %p1391_p9 = pnand %p1389_p7, %p1635_p8 }
  0x6e   : > { %p1392_p4 = pneg %p1391_p9 }
  0x70   : > { %p1397_p3 = pnand %p1395_p1, %p1392_p4 }
  0x72   : > { %1400 = shalt.err (!%p1397_p3)
}
  0x73   : > { %s1401_s29 = scalar_lea.vmem %s246_s17, 768  ;;  %p1409_p13 = scmp.lt.s32.totalorder %s246_s17, %s246_s17 }
  0x74   : > { %p1402_p10 = scmp.ne.s32.totalorder %s246_s17, %s1401_s29  ;;  %p1410_p0 = scmp.lt.s32.totalorder %s1401_s29, %s1401_s29 }
  0x76   : > { %p1404_p11 = pnand %p1402_p10, %p1635_p8  ;;  %p1411_p2 = por %p1410_p0, %p1409_p13 }
  0x78   : > { %p1405_p12 = pneg %p1404_p11 }
  0x7a   : > { %p1412_p5 = pnand %p1411_p2, %p1405_p12 }
  0x7c   : > { %1415 = shalt.err (!%p1412_p5)
}
  0x7d   : > { %s1533_s14 = smov 384   ;;  %s1534_s15 = smov 24  }
  0x7e   : > { %1198 = dma.hbm_to_vmem [thread:$0]  (!%p1621_p6), %s2026_s5, 768, %s246_s17, [#allocation13], %s1533_s14, %s1533_s14, %s1534_s15  }
  0x7f   : > { %s1097_s9 = sadd.s32 4294967294, %s1524_s24   ;;  %s1735_s11 = sadd.s32 1, %s1524_s24  }
  0x80   : > { %s32_s30 = sadd.s32 1, %s1520_s23  ;;  %s29_s12 = ssub.s32 %s1524_s24, %s1735_s11 }
  0x81   : > { %p39_p8 = scmp.ne.s32.totalorder %s1520_s23, %s1516_s22  ;;  %p30_p7 = scmp.eq.s32.totalorder %s29_s12, 0 }
  0x82   : > { %p40_p9 = scmp.eq.s32.totalorder %s1524_s24, 0  ;;  %p45_p4 = scmp.ne.s32.totalorder %s1516_s22, %s1512_s21 }
  0x83   : > { %p174_p1 = scmp.eq.s32.totalorder %s1605_s27, 1  ;;  %p2034_p10 = scmp.eq.s32.totalorder %s1605_s27, 0 }
  0x84   : > { %s1747_s13 = scalar_select %p30_p7, %s1520_s23, %s32_s30  }
  0x85   : > { %p41_p3 = por %p40_p9, %p39_p8  ;;  %p1751_p11 = por %p2034_p10, %p45_p4 }
  0x86   : > { %p1755_p6 = por %p174_p1, %p39_p8  ;;  %p180_p12 = scmp.eq.s32.totalorder %s1097_s9, 1 }
  0x87   : > { %p1212_p13 = scmp.lt.s32.totalorder %s1524_s24, 2  ;;  %s259_s26 = sand.u32 1, %s1520_s23  }
  0x88   : > { %s2036_s17 = scalar_select %p1755_p6, 1, 0 }
  0x89   : > { %p1761_p0 = por %p180_p12, %p45_p4  ;;  %s1156_s18 = smul.u32 12, %s259_s26 }
  0x8a   : > { %p1765_p2 = pnand %p1212_p13, %p41_p3  ;;  %s1157_s20 = smul.u32 192, %s1524_s24 }
  0x8b   : > { %s2037_s16 = scalar_select %p1761_p0, 1, 0 }
  0x8c   : > { %s1773_s14 = scalar_lea.hbm %s2021_s0, %s1157_s20  ;;  %s263_s15 = scalar_lea.vmem [#allocation3], %s1156_s18 }
  0x8d   : > { %s271_s8 = sshll.u32 %s263_s15, 4  ;;  %s260_s10 = scalar_lea.sflag [#allocation4], %s259_s26  ;;  %s1775_s8 = int_to_ptr.vmem [resolvable:$true] %s271_s8 }
  0x8e   : > { %s1416_s9 = scalar_lea.hbm %s1773_s14, 192  ;;  %p1418_p8 = pneg %p1765_p2 }
  0x8f   : > { %p1417_p5 = scmp.ne.s32.totalorder %s1773_s14, %s1416_s9  ;;  %s1421_s20 = scalar_lea.hbm %s2021_s0, 384 }
  0x90   : > { %p1422_p4 = scmp.lt.u32.totalorder %s1773_s14, %s2021_s0  ;;  %p1423_p1 = scmp.lt.u32.totalorder %s1421_s20, %s1416_s9 }
  0x91   : > { %p1419_p7 = pnand %p1418_p8, %p1417_p5  ;;  %p1425_p10 = scmp.lt.u32.totalorder %s1416_s9, %s1773_s14 }
  0x92   : > { %p1424_p3 = por %p1423_p1, %p1422_p4 }
  0x93   : > { %p1420_p9 = pneg %p1419_p7 }
  0x94   : > { %p1426_p12 = por %p1425_p10, %p1424_p3 }
  0x96   : > { %p1427_p13 = pnand %p1426_p12, %p1420_p9 }
  0x98   : > { %1430 = shalt.err (!%p1427_p13)
}
  0x99   : > { %s1431_s26 = scalar_lea.vmem %s1775_s8, 192  ;;  %s1535_s18 = smov [#allocation3]  }
  0x9a   : > { %p1432_p5 = scmp.ne.s32.totalorder %s1775_s8, %s1431_s26  ;;  %s1436_s15 = sshll.u32 %s1535_s18, 4  ;;  %s1437_s15 = int_to_ptr.vmem [resolvable:$false] %s1436_s15 }
  0x9b   : > { %s1438_s30 = scalar_lea.vmem %s1437_s15, 384  ;;  %p1439_p6 = scmp.lt.s32.totalorder %s1775_s8, %s1437_s15 }
  0x9c   : > { %p1434_p7 = pnand %p1432_p5, %p1418_p8  ;;  %p1440_p4 = scmp.lt.s32.totalorder %s1438_s30, %s1431_s26 }
  0x9e   : > { %p1435_p0 = pneg %p1434_p7  ;;  %p1441_p1 = por %p1440_p4, %p1439_p6 }
  0xa0   : > { %p1442_p3 = pnand %p1441_p1, %p1435_p0 }
  0xa2   : > { %1445 = shalt.err (!%p1442_p3)
}
  0xa3   : > { %1202 = dma.hbm_to_vmem [thread:$0]  (!%p1765_p2), %s1773_s14, 192, %s1775_s8, %s260_s10  }
  0xa4   : > { %p2039_p9 = scmp.ne.s32.totalorder %s2031_s28, 0 }
  0xa5   : > { %s1805_s9 = sand.u32 (!%p2039_p9), 1, %s1516_s22  }
  0xa6   : > { %280 = sbr.rel (%p2039_p9) target bundleno = 775 (0x307), region = 44  ;;  %s283_s20 = scalar_lea.sflag (!%p2039_p9), [#allocation4], %s1805_s9 }
  0xa7   : > { %s1158_s12 = smul.u32 (!%p2039_p9), 12, %s1805_s9 }
  0xa9   : > { %s286_s25 = scalar_lea.vmem (!%p2039_p9), [#allocation3], %s1158_s12 }
  0xad   : > { %1491 = dma.done.wait (%p1751_p11), %s283_s20, 192  }
  0xae   : > { %1493 = vsyncadd (%p1751_p11), %s283_s20, 4294967104  ;;  %p2040_p6 = scmp.eq.s32.totalorder %s1605_s27, 0 }
  0xb0   : > { %1495 = dma.done.wait (%p2040_p6), [#allocation7], 128   ;;  %p2041_p0 = pmov %p2040_p6 }
  0xb2   : > { %1497 = vsyncadd (%p2041_p0), [#allocation7], 4294967168  ;;  %p2042_p2 = pmov %p2041_p0 }
  0xb3   : > { %p2043_p8 = pmov %p2041_p0 }
  0xb4   : > { %1499 = dma.done.wait (%p2042_p2), [#allocation10], 656  }
  0xb5   : > { %1501 = vsyncadd (%p2043_p8), [#allocation10], 4294966640  ;;  %p2044_p10 = pmov %p2041_p0 }
  0xb6   : > { %p2045_p12 = pmov %p2041_p0 }
  0xb7   : > { %1503 = dma.done.wait (%p2044_p10), [#allocation13], 768  }
  0xb8   : > { %1505 = vsyncadd (%p2045_p12), [#allocation13], 4294966528  ;;  %vm336_vm0 = vcmask 150528   ;;  %vm379_vm1 = vcmask 134144   ;;  %v1536_v0 = vmov 0.0   ;;  %vm358_vm2 = vcmask 146436  }
  0xb9   : > { %337 = vst.msk [vmem:[#allocation2] sm:$0xf] %vm336_vm0, %v1536_v0  ;;  %591 = vmatprep.mubr.f32.mxu0 %v1536_v0  ;;  %vm397_vm3 = vcmask 7172   ;;  %v334_v1 = vld [vmem:[%s286_s25] sm:$0xff]  ;;  %v335_v2 = vld [vmem:[%s286_s25 + $0x8] sm:$0xf] }
  0xba   : > { %380 = vst.msk [vmem:[#allocation2 + $0x18] sm:$0xf] %vm379_vm1, %v1536_v0  ;;  %vm356_vm4 = vcmask 551936   ;;  %s1537_s28 = smov 18   ;;  %416 = vst [vmem:[#allocation2 + $0x30] sm:$0xf] %v334_v1  ;;  %v360_v3 = vcombine.low %v334_v1, %v334_v1  ;;  %v340_v4 = vcombine.high %v334_v1, %v334_v1  ;;  %v361_v5 = vcombine.low %v335_v2, %v335_v2 }
  0xbb   : > { %359 = vst.msk [vmem:[#allocation2] sm:$0xf0] %vm358_vm2, %v1536_v0  ;;  %364 = vrot.lane.b32.xlu1 %v334_v1, %s1537_s28  ;;  %s1538_s7 = smov 19   ;;  %s1539_s19 = smov 17   ;;  %vm419_vm5 = vcmask 556572   ;;  %vm437_vm6 = vcmask 552344  }
  0xbc   : > { %398 = vst.msk [vmem:[#allocation2 + $0x18] sm:$0xf0] %vm397_vm3, %v1536_v0  ;;  %341 = vrot.lane.b32.xlu0 %v334_v1, %s1538_s7  ;;  %417 = vst [vmem:[#allocation2 + $0x38] sm:$0xf] %v340_v4  ;;  %s1540_s14 = smov 1   ;;  %vm455_vm7 = vcmask 556436  }
  0xbd   : > { %418 = vst.msk [vmem:[#allocation2 + $0x40] sm:$0xf] %vm356_vm4, %v335_v2  ;;  %v1541_v6 = vmov 0.0|0.0   ;;  %s1542_s8 = smov 127   ;;  %s1543_s10 = smov 111   ;;  %vm473_vm8 = vcmask 552328  }
  0xbe   : > { %420 = vst.msk [vmem:[#allocation2 + $0x40] sm:$0xf0] %vm419_vm5, %v1536_v0  ;;  %1150 = vmatprep.subr.bf16.mxu1 %v1541_v6  ;;  %s1544_s29 = smov 110   ;;  %s1545_s26 = smov 109   ;;  %vm1546_vm9 = vmmov 0   ;;  %v1547_v7 = vmov 0  }
  0xbf   : > { %362 = vrot.lane.b32.xlu1 %v360_v3, %s1537_s28  ;;  %438 = vst.msk [vmem:[#allocation2 + $0x58] sm:$0xf] %vm437_vm6, %v1536_v0  ;;  %1139 = vmatprep.mubr.msk.f32.mxu1 %vm1546_vm9, %v1536_v0  ;;  %v507_v8 = vld [vmem:[#allocation8] sm:$0xf]  ;;  %vm353_vm10 = vcmask 1043608   ;;  %vm393_vm11 = vcmask 1043592  }
  0xc0   : > { %381 = vrot.lane.b32.xlu0 %v334_v1, %s1539_s19  ;;  %456 = vst.msk [vmem:[#allocation2 + $0x58] sm:$0xf0] %vm455_vm7, %v1536_v0  ;;  %vm368_vm12 = vcmask 146432   ;;  %vm374_vm13 = vcmask 1047700   ;;  %vm387_vm14 = vcmask 138240   ;;  %vm347_vm15 = vcmask 154624  }
  0xc1   : > { %474 = vst.msk [vmem:[#allocation2 + $0x70] sm:$0xf] %vm473_vm8, %v1536_v0  ;;  %1272 = vset.pattern.permute.xlu0 %v1547_v7  ;;  %vm405_vm0 = vcmask 7168   ;;  %vm411_vm1 = vcmask 1047564   ;;  %vm377_vm2 = vcmask 556036   ;;  %vm435_vm3 = vcmask 547844  }
  0xc2   : > { %vm427_vm5 = vcmask 1039360   ;;  %vm453_vm6 = vcmask 412672   ;;  %vm445_vm7 = vcmask 908288   ;;  %vm471_vm8 = vcmask 408580   ;;  %s1120_s18 = sshll.u32 %s1605_s27, 4  ;;  %s333_s15 = scalar_lea.vmem [#allocation14], %s1805_s9 }
  0xc3   : > { %383 = vrot.lane.b32.xlu1 %v340_v4, %s1539_s19  ;;  %vm463_vm9 = vcmask 900096   ;;  %v677_v7 = vlaneseq  ;;  %s983_s30 = sshll.u32 %s333_s15, 4  ;;  %s1977_s25 = scalar_lea.hbm %s2027_s6, %s1120_s18  ;;  %s1979_s30 = int_to_ptr.vmem [resolvable:$true] %s983_s30 }
  0xc4   : > { %343 = vrot.lane.b32.xlu0 %v340_v4, %s1538_s7  ;;  %p2046_p13 = scmp.ne.s32.totalorder %s2036_s17, 0  ;;  %s1548_s27 = smov [#allocation14]  }
  0xc7   : > { %401 = vrot.lane.b32.xlu1 %v334_v1, %s1540_s14 }
  0xc8   : > { %399 = vrot.lane.b32.xlu0 %v360_v3, %s1540_s14 }
  0xcb   : > { %366 = vrot.lane.b32.xlu1 %v361_v5, %s1537_s28  ;;  %s971_s28 = scalar_lea.sflag [#allocation5], %s1805_s9 }
  0xcc   : > { %345 = vrot.lane.b32.xlu0 %v335_v2, %s1538_s7  ;;  %s1446_s7 = scalar_lea.vmem %s1979_s30, 16 }
  0xcd   : > { %p1447_p11 = scmp.ne.s32.totalorder %s1979_s30, %s1446_s7 }
  0xcf   : > { %403 = vrot.lane.b32.xlu1 %v361_v5, %s1540_s14  ;;  %p1448_p5 = pnand %p1447_p11, %p2046_p13 }
  0xd0   : > { %385 = vrot.lane.b32.xlu0 %v335_v2, %s1539_s19  ;;  %s1450_s19 = sshll.u32 %s1548_s27, 4  ;;  %s1451_s19 = int_to_ptr.vmem [resolvable:$false] %s1450_s19 }
  0xd1   : > { %p1449_p7 = pneg %p1448_p5  ;;  %s1452_s14 = scalar_lea.vmem %s1451_s19, 32 }
  0xd2   : > { %p1453_p4 = scmp.lt.s32.totalorder %s1979_s30, %s1451_s19  ;;  %p1454_p1 = scmp.lt.s32.totalorder %s1452_s14, %s1446_s7 }
  0xd3   : > { %425 = vrot.lane.b32.xlu1 %v361_v5, %s1542_s8 }
  0xd4   : > { %423 = vrot.lane.b32.xlu0 %v334_v1, %s1542_s8  ;;  %p1455_p3 = por %p1454_p1, %p1453_p4 }
  0xd6   : > { %p1456_p9 = pnand %p1455_p3, %p1449_p7 }
  0xd7   : > { %443 = vrot.lane.b32.xlu1 %v335_v2, %s1543_s10 }
  0xd8   : > { %441 = vrot.lane.b32.xlu0 %v340_v4, %s1543_s10 }
  0xdb   : > { %461 = vrot.lane.b32.xlu1 %v361_v5, %s1544_s29 }
  0xdc   : > { %459 = vrot.lane.b32.xlu0 %v334_v1, %s1544_s29 }
  0xdf   : > { %439 = vrot.lane.b32.xlu1 %v334_v1, %s1543_s10 }
  0xe0   : > { %421 = vrot.lane.b32.xlu0 %v360_v3, %s1542_s8 }
  0xe3   : > { %477 = vrot.lane.b32.xlu1 %v340_v4, %s1545_s26  ;;  %v491_v4 = vld [vmem:[#allocation6] sm:$0xf] }
  0xe4   : > { %457 = vrot.lane.b32.xlu0 %v360_v3, %s1544_s29 }
  0xe7   : > { %475 = vrot.lane.b32.xlu1 %v334_v1, %s1545_s26 }
  0xe8   : > { %479 = vrot.lane.b32.xlu0 %v335_v2, %s1545_s26 }
  0xec   : > { %510 = vperm.xlu0 %1272, %v507_v8   ;;  %v678_v8 = vshrl.u32 %v677_v7, 7 }
 0x12d   : > { %v365_v9 = vpop.permute.xlu1 %364 }
 0x12e   : > { %v342_v10 = vpop.permute.xlu0 %341 }
 0x12f   : > { %354 = vst.msk [vmem:[#allocation2] sm:$0xf] %vm353_vm10, %v342_v10  ;;  %vm481_vm10 = vcmask 891904  }
 0x131   : > { %v363_v12 = vpop.permute.xlu1 %362 }
 0x132   : > { %v382_v11 = vpop.permute.xlu0 %381  ;;  %v369_v13 = vsel %vm368_vm12, %v363_v12, %v365_v9  ;;  %375 = vst.msk [vmem:[#allocation2] sm:$0xf0] %vm374_vm13, %v363_v12  ;;  %vm513_vm13 = vcmask 293888   ;;  %v776_v12 = vsub.s32 3, %v678_v8 }
 0x133   : > { %394 = vst.msk [vmem:[#allocation2 + $0x18] sm:$0xf] %vm393_vm11, %v382_v11  ;;  %376 = vst [vmem:[#allocation2 + $0x8] sm:$0xf0] %v369_v13  ;;  %vm489_vm11 = vcmask 396288   ;;  %v744_v13 = vsub.s32 2, %v678_v8 }
 0x135   : > { %v384_v14 = vpop.permute.xlu1 %383 }
 0x136   : > { %v344_v15 = vpop.permute.xlu0 %343  ;;  %v388_v16 = vsel %vm387_vm14, %v382_v11, %v384_v14  ;;  %v1858_v11 = vld [vmem:[#allocation12] sm:$0xff] }
 0x137   : > { %v348_v17 = vsel %vm347_vm15, %v342_v10, %v344_v15  ;;  %395 = vst [vmem:[#allocation2 + $0x20] sm:$0xf] %v388_v16  ;;  %v679_v10 = vsub.s32 0, %v678_v8 }
 0x138   : > { %355 = vst [vmem:[#allocation2 + $0x8] sm:$0xf] %v348_v17 }
 0x139   : > { %v402_v18 = vpop.permute.xlu1 %401  ;;  %v492_v33 = vld [vmem:[#allocation2] sm:$0xff]  ;;  %v680_v17 = vrot.slane %v1858_v11, %v679_v10 }
 0x13a   : > { %v400_v19 = vpop.permute.xlu0 %399 }
 0x13b   : > { %v406_v20 = vsel %vm405_vm0, %v400_v19, %v402_v18  ;;  %412 = vst.msk [vmem:[#allocation2 + $0x18] sm:$0xf0] %vm411_vm1, %v400_v19 }
 0x13c   : > { %413 = vst [vmem:[#allocation2 + $0x20] sm:$0xf0] %v406_v20 }
 0x13d   : > { %v367_v21 = vpop.permute.xlu1 %366 }
 0x13e   : > { %v346_v22 = vpop.permute.xlu0 %345  ;;  %v370_v23 = vsel %vm368_vm12, %v365_v9, %v367_v21  ;;  %vm517_vm12 = vcmask 1043456   ;;  %v712_v9 = vsub.s32 1, %v678_v8  ;;  %v777_v21 = vrot.slane %v1858_v11, %v776_v12 }
 0x13f   : > { %v349_v24 = vsel %vm347_vm15, %v344_v15, %v346_v22  ;;  %378 = vst.msk [vmem:[#allocation2 + $0x10] sm:$0xf0] %vm377_vm2, %v370_v23  ;;  %v493_v30 = vld [vmem:[#allocation2 + $0x8] sm:$0xff]  ;;  %v1862_v15 = vld [vmem:[#allocation12 + $0x10] sm:$0xff]  ;;  %v745_v22 = vrot.slane %v1858_v11, %v744_v13  ;;  %v1871_v23 = vsub.s32 4, %v678_v8 }
 0x140   : > { %357 = vst.msk [vmem:[#allocation2 + $0x10] sm:$0xf] %vm356_vm4, %v349_v24  ;;  %v713_v16 = vrot.slane %v1858_v11, %v712_v9  ;;  %v721_v24 = vrot.slane %v1862_v15, %v712_v9 }
 0x141   : > { %v404_v25 = vpop.permute.xlu1 %403 }
 0x142   : > { %v386_v26 = vpop.permute.xlu0 %385  ;;  %v495_v27 = vld [vmem:[#allocation2 + $0x18] sm:$0xff]  ;;  %v407_v28 = vsel %vm405_vm0, %v402_v18, %v404_v25  ;;  %v1866_v18 = vsub.s32 5, %v678_v8 }
 0x143   : > { %v389_v29 = vsel %vm387_vm14, %v384_v14, %v386_v26  ;;  %v496_v31 = vld [vmem:[#allocation2 + $0x20] sm:$0xff]  ;;  %414 = vst.msk [vmem:[#allocation2 + $0x28] sm:$0xf0] %vm377_vm2, %v407_v28  ;;  %v1144_v34 = vpack.c.bf16 %v495_v27, %v492_v33  ;;  %v1860_v14 = vld [vmem:[#allocation12 + $0x8] sm:$0xff]  ;;  %v688_v26 = vrot.slane %v1862_v15, %v679_v10  ;;  %v1876_v27 = vsub.s32 7, %v678_v8 }
 0x144   : > { %396 = vst.msk [vmem:[#allocation2 + $0x28] sm:$0xf] %vm356_vm4, %v389_v29  ;;  %v1142_v32 = vpack.c.bf16 %v496_v31, %v493_v30  ;;  %v717_v20 = vrot.slane %v1860_v14, %v712_v9  ;;  %v684_v25 = vrot.slane %v1860_v14, %v679_v10  ;;  %v781_v29 = vrot.slane %v1860_v14, %v776_v12 }
 0x145   : > { %v426_v35 = vpop.permute.xlu1 %425  ;;  %v785_v30 = vrot.slane %v1862_v15, %v776_v12  ;;  %v749_v31 = vrot.slane %v1860_v14, %v744_v13  ;;  %vm701_vm14 = vcmask 27648  }
 0x146   : > { %1143 = vmatprep.subr.bf16.mxu0 %v1142_v32  ;;  %v424_v36 = vpop.permute.xlu0 %423  ;;  %436 = vst.msk [vmem:[#allocation2 + $0x40] sm:$0xf0] %vm435_vm3, %v426_v35  ;;  %v1881_v32 = vsub.s32 6, %v678_v8 }
 0x147   : > { %v429_v37 = vsel %vm427_vm5, %v424_v36, %v426_v35  ;;  %1145 = vmatpush1.bf16.msra.mxu0 %v1144_v34  ;;  %v494_v41 = vld [vmem:[#allocation2 + $0x10] sm:$0xff]  ;;  %v753_v35 = vrot.slane %v1862_v15, %v744_v13 }
 0x148   : > { %434 = vst [vmem:[#allocation2 + $0x38] sm:$0xf0] %v429_v37  ;;  %v845_v37 = vrot.slane %v1860_v14, %v1866_v18 }
 0x149   : > { %v444_v38 = vpop.permute.xlu1 %443 }
 0x14a   : > { %v442_v39 = vpop.permute.xlu0 %441  ;;  %454 = vst.msk [vmem:[#allocation2 + $0x58] sm:$0xf] %vm453_vm6, %v444_v38 }
 0x14b   : > { %v447_v40 = vsel %vm445_vm7, %v442_v39, %v444_v38  ;;  %v497_v42 = vld [vmem:[#allocation2 + $0x28] sm:$0xff]  ;;  %v849_v38 = vrot.slane %v1862_v15, %v1866_v18 }
 0x14c   : > { %452 = vst [vmem:[#allocation2 + $0x50] sm:$0xf] %v447_v40  ;;  %v1151_v43 = vpack.c.bf16 %v497_v42, %v494_v41  ;;  %v813_v40 = vrot.slane %v1860_v14, %v1871_v23  ;;  %v817_v41 = vrot.slane %v1862_v15, %v1871_v23 }
 0x14d   : > { %v462_v44 = vpop.permute.xlu1 %461  ;;  %v500_v53 = vld [vmem:[#allocation2 + $0x40] sm:$0xff] }
 0x14e   : > { %1152 = vmatpush3.bf16.msra.mxu1 %v1151_v43  ;;  %v460_v45 = vpop.permute.xlu0 %459  ;;  %472 = vst.msk [vmem:[#allocation2 + $0x58] sm:$0xf0] %vm471_vm8, %v462_v44 }
 0x14f   : > { %v465_v46 = vsel %vm463_vm9, %v460_v45, %v462_v44  ;;  %1153 = vmatprep.subr.bf16.mxu1 %v1541_v6  ;;  %v499_v57 = vld [vmem:[#allocation2 + $0x38] sm:$0xff]  ;;  %v905_v44 = vrot.slane %v1858_v11, %v1876_v27 }
 0x150   : > { %470 = vst [vmem:[#allocation2 + $0x50] sm:$0xf0] %v465_v46  ;;  %v913_v46 = vrot.slane %v1862_v15, %v1876_v27 }
 0x151   : > { %v440_v47 = vpop.permute.xlu1 %439 }
 0x152   : > { %v422_v48 = vpop.permute.xlu0 %421  ;;  %v446_v49 = vsel %vm445_vm7, %v440_v47, %v442_v39  ;;  %v809_v39 = vrot.slane %v1858_v11, %v1871_v23 }
 0x153   : > { %v428_v50 = vsel %vm427_vm5, %v422_v48, %v424_v36  ;;  %451 = vst [vmem:[#allocation2 + $0x48] sm:$0xf] %v446_v49  ;;  %v841_v36 = vrot.slane %v1858_v11, %v1866_v18  ;;  %v873_v49 = vrot.slane %v1858_v11, %v1881_v32 }
 0x154   : > { %433 = vst [vmem:[#allocation2 + $0x30] sm:$0xf0] %v428_v50  ;;  %v877_v50 = vrot.slane %v1860_v14, %v1881_v32 }
 0x155   : > { %v478_v51 = vpop.permute.xlu1 %477  ;;  %v503_v54 = vld [vmem:[#allocation2 + $0x58] sm:$0xff] }
 0x156   : > { %v458_v52 = vpop.permute.xlu0 %457  ;;  %v1154_v56 = vpack.c.bf16 %v503_v54, %v500_v53 }
 0x157   : > { %v464_v55 = vsel %vm463_vm9, %v458_v52, %v460_v45  ;;  %v502_v58 = vld [vmem:[#allocation2 + $0x50] sm:$0xff]  ;;  %v909_v45 = vrot.slane %v1860_v14, %v1876_v27 }
 0x158   : > { %469 = vst [vmem:[#allocation2 + $0x48] sm:$0xf0] %v464_v55  ;;  %v1146_v59 = vpack.c.bf16 %v502_v58, %v499_v57  ;;  %1155 = vmatpush3.bf16.msra.mxu1 %v1154_v56 }
 0x159   : > { %v476_v60 = vpop.permute.xlu1 %475  ;;  %1137 = vmatprep.subr.mxu1 %v1536_v0 }
 0x15a   : > { %v480_v61 = vpop.permute.xlu0 %479  ;;  %1147 = vmatprep.subr.bf16.mxu0 %v1146_v59  ;;  %v482_v62 = vsel %vm481_vm10, %v476_v60, %v478_v51 }
 0x15b   : > { %v483_v63 = vsel %vm481_vm10, %v478_v51, %v480_v61  ;;  %490 = vst.msk [vmem:[#allocation2 + $0x70] sm:$0xf] %vm489_vm11, %v480_v61  ;;  %487 = vst [vmem:[#allocation2 + $0x60] sm:$0xf] %v482_v62  ;;  %v498_v1 = vld [vmem:[#allocation2 + $0x30] sm:$0xff]  ;;  %v881_v51 = vrot.slane %v1862_v15, %v1881_v32 }
 0x15c   : > { %488 = vst [vmem:[#allocation2 + $0x68] sm:$0xf] %v483_v63 }
 0x15f   : > { %v501_v2 = vld [vmem:[#allocation2 + $0x48] sm:$0xff] }
 0x160   : > { %v1148_v3 = vpack.c.bf16 %v501_v2, %v498_v1 }
 0x162   : > { %1149 = vmatpush1.bf16.msra.mxu0 %v1148_v3  ;;  %v506_v5 = vld [vmem:[#allocation2 + $0x70] sm:$0xf]  ;;  %v504_v0 = vld [vmem:[#allocation2 + $0x60] sm:$0xf] }
 0x163   : > { %v505_v6 = vld [vmem:[#allocation2 + $0x68] sm:$0xf]  ;;  %1138 = vmatpush3.msk.msra.mxu1 %vm517_vm12, %v506_v5 }
 0x164   : > { %1112 = vmatprep.subr.msk.mxu0 %vm517_vm12, %v505_v6  ;;  %1140 = vmatmul.mubr.msk.f32.vlgmr.msra.gmra.mrb[0].mxu1 %vm513_vm13, %v491_v4 }
 0x166   : > { %1113 = vmatpush1.msk.msra.mxu0 %vm517_vm12, %v504_v0 }
 0x167   : > { %1114 = vmatmul.mubr.msk.f32.vlgmr.msra.gmra.mrb[0].mxu0 %vm513_vm13, %v491_v4 }
 0x16b   : > { %v511_v19 = vpop.permute.xlu0 %510 }
 0x237   : > { %v664_v28 = vpop.f32.mrb[0].mxu1 }
 0x238   : > { %v665_v33 = vadd.f32 %v664_v28, %v511_v19  ;;  %v1141_v34 = vpop.f32.mrb[1].mxu1 }
 0x23a   : > { %v593_v42 = vpop.f32.mrb[0].mxu0  ;;  %v1896_v43 = vmax.f32 %v665_v33, 0.0 }
 0x23b   : > { %v594_v47 = vadd.f32 %v593_v42, %v511_v19  ;;  %v595_v48 = vpop.f32.mrb[1].mxu0 }
 0x23c   : > { %v596_v52 = vadd.f32 %v595_v48, %v511_v19  ;;  %v724_v53 = vmul.f32 %v721_v24, %v1896_v43  ;;  %v691_v54 = vmul.f32 %v688_v26, %v1896_v43  ;;  %v788_v55 = vmul.f32 %v785_v30, %v1896_v43 }
 0x23d   : > { %v1913_v56 = vmax.f32 %v594_v47, 0.0  ;;  %v756_v57 = vmul.f32 %v753_v35, %v1896_v43  ;;  %v852_v58 = vmul.f32 %v849_v38, %v1896_v43  ;;  %v820_v59 = vmul.f32 %v817_v41, %v1896_v43 }
 0x23e   : > { %v669_v60 = vmax.f32 %v596_v52, 0.0  ;;  %v728_v61 = vsel %vm356_vm4, %v724_v53, 0.0  ;;  %v695_v62 = vsel %vm356_vm4, %v691_v54, 0.0  ;;  %v792_v63 = vsel %vm356_vm4, %v788_v55, 0.0  ;;  %v1117_v52 = vld [vmem:[#allocation12 + $0x18] ss:$0 sm:$0xff] }
 0x23f   : > { %v722_v1 = vmul.f32 %v713_v16, %v1913_v56  ;;  %v689_v2 = vmul.f32 %v680_v17, %v1913_v56  ;;  %v786_v3 = vmul.f32 %v777_v21, %v1913_v56  ;;  %v754_v4 = vmul.f32 %v745_v22, %v1913_v56  ;;  %v1118_v53 = vld [vmem:[#allocation12 + $0x20] ss:$0 sm:$0xff] }
 0x240   : > { %v723_v5 = vmul.f32 %v717_v20, %v669_v60  ;;  %v690_v6 = vmul.f32 %v684_v25, %v669_v60  ;;  %v787_v0 = vmul.f32 %v781_v29, %v669_v60  ;;  %v755_v7 = vmul.f32 %v749_v31, %v669_v60 }
 0x241   : > { %v725_v8 = vsel %vm517_vm12, %v722_v1, 0.0  ;;  %v692_v9 = vsel %vm517_vm12, %v689_v2, 0.0  ;;  %v789_v10 = vsel %vm517_vm12, %v786_v3, 0.0  ;;  %v757_v11 = vsel %vm517_vm12, %v754_v4, 0.0 }
 0x242   : > { %v726_v12 = vsel %vm517_vm12, %v723_v5, 0.0  ;;  %v693_v13 = vsel %vm517_vm12, %v690_v6, 0.0  ;;  %v790_v16 = vsel %vm517_vm12, %v787_v0, 0.0  ;;  %v758_v17 = vsel %vm517_vm12, %v755_v7, 0.0  ;;  %v699_v5 = vld [vmem:[#allocation9] sm:$0xf] }
 0x243   : > { %v727_v18 = vadd.f32 %v726_v12, %v725_v8  ;;  %v694_v19 = vadd.f32 %v693_v13, %v692_v9  ;;  %v791_v20 = vadd.f32 %v790_v16, %v789_v10  ;;  %v759_v21 = vadd.f32 %v758_v17, %v757_v11  ;;  %v796_v8 = vld [vmem:[#allocation9 + $0xc] sm:$0xf]  ;;  %v764_v9 = vld [vmem:[#allocation9 + $0x8] sm:$0xf] }
 0x244   : > { %v760_v22 = vsel %vm356_vm4, %v756_v57, 0.0  ;;  %v850_v23 = vmul.f32 %v841_v36, %v1913_v56  ;;  %v851_v24 = vmul.f32 %v845_v37, %v669_v60  ;;  %v856_v25 = vsel %vm356_vm4, %v852_v58, 0.0  ;;  %v1119_v57 = vld [vmem:[#allocation12 + $0x28] ss:$0 sm:$0xff] }
 0x245   : > { %v729_v26 = vadd.f32 %v728_v61, %v727_v18  ;;  %v696_v27 = vadd.f32 %v695_v62, %v694_v19  ;;  %v793_v28 = vadd.f32 %v792_v63, %v791_v20  ;;  %v761_v29 = vadd.f32 %v760_v22, %v759_v21  ;;  %v860_v22 = vld [vmem:[#allocation9 + $0x14] sm:$0xf] }
 0x246   : > { %v853_v30 = vsel %vm517_vm12, %v850_v23, 0.0  ;;  %v854_v31 = vsel %vm517_vm12, %v851_v24, 0.0  ;;  %v818_v33 = vmul.f32 %v809_v39, %v1913_v56  ;;  %v819_v34 = vmul.f32 %v813_v40, %v669_v60  ;;  %v828_v23 = vld [vmem:[#allocation9 + $0x10] sm:$0xf] }
 0x247   : > { %730 = vadd.xlane.f32.xlu0 %v729_v26  ;;  %697 = vadd.xlane.f32.xlu1 %v696_v27  ;;  %v855_v35 = vadd.f32 %v854_v31, %v853_v30  ;;  %v824_v38 = vsel %vm356_vm4, %v820_v59, 0.0  ;;  %v914_v36 = vmul.f32 %v905_v44, %v1913_v56  ;;  %v915_v37 = vmul.f32 %v909_v45, %v669_v60 }
 0x248   : > { %v821_v41 = vsel %vm517_vm12, %v818_v33, 0.0  ;;  %v822_v42 = vsel %vm517_vm12, %v819_v34, 0.0  ;;  %v916_v47 = vmul.f32 %v913_v46, %v1896_v43  ;;  %v882_v48 = vmul.f32 %v873_v49, %v1913_v56 }
 0x249   : > { %v857_v39 = vadd.f32 %v856_v25, %v855_v35  ;;  %v823_v40 = vadd.f32 %v822_v42, %v821_v41  ;;  %v917_v54 = vsel %vm517_vm12, %v914_v36, 0.0  ;;  %v918_v55 = vsel %vm517_vm12, %v915_v37, 0.0  ;;  %v924_v41 = vld [vmem:[#allocation9 + $0x1c] sm:$0xf]  ;;  %v892_v42 = vld [vmem:[#allocation9 + $0x18] sm:$0xf] }
 0x24a   : > { %v919_v58 = vadd.f32 %v918_v55, %v917_v54  ;;  %v920_v44 = vsel %vm356_vm4, %v916_v47, 0.0  ;;  %v883_v45 = vmul.f32 %v877_v50, %v669_v60  ;;  %v884_v46 = vmul.f32 %v881_v51, %v1896_v43 }
 0x24b   : > { %794 = vadd.xlane.f32.xlu0 %v793_v28  ;;  %762 = vadd.xlane.f32.xlu1 %v761_v29  ;;  %v825_v49 = vadd.f32 %v824_v38, %v823_v40  ;;  %v885_v59 = vsel %vm517_vm12, %v882_v48, 0.0  ;;  %v946_v61 = vmul.f32 %v1117_v52, %v1913_v56  ;;  %v947_v62 = vmul.f32 %v1118_v53, %v669_v60  ;;  %v732_v60 = vld [vmem:[#allocation9 + $0x4] sm:$0xf] }
 0x24c   : > { %v921_v63 = vadd.f32 %v920_v44, %v919_v58  ;;  %v886_v1 = vsel %vm517_vm12, %v883_v45, 0.0  ;;  %v948_v2 = vmul.f32 %v1119_v57, %v1896_v43  ;;  %v888_v15 = vsel %vm356_vm4, %v884_v46, 0.0 }
 0x24d   : > { %v887_v14 = vadd.f32 %v886_v1, %v885_v59  ;;  %v949_v50 = vsel %vm517_vm12, %v946_v61, 0.0  ;;  %v950_v3 = vsel %vm517_vm12, %v947_v62, 0.0  ;;  %v956_v62 = vld [vmem:[#allocation9 + $0x20] sm:$0xf] }
 0x24e   : > { %v951_v32 = vadd.f32 %v950_v3, %v949_v50  ;;  %v952_v4 = vsel %vm356_vm4, %v948_v2, 0.0  ;;  %vm968_vm4 = vcmask 24576  }
 0x24f   : > { %858 = vadd.xlane.f32.xlu0 %v857_v39  ;;  %826 = vadd.xlane.f32.xlu1 %v825_v49  ;;  %v889_v51 = vadd.f32 %v888_v15, %v887_v14 }
 0x250   : > { %v953_v56 = vadd.f32 %v952_v4, %v951_v32 }
 0x253   : > { %922 = vadd.xlane.f32.xlu0 %v921_v63  ;;  %890 = vadd.xlane.f32.xlu1 %v889_v51 }
 0x257   : > { %954 = vadd.xlane.f32.xlu1 %v953_v56 }
 0x2d4   : > { %v731_v43 = vpop.xlane.xlu0 %730  ;;  %v698_v6 = vpop.xlane.xlu1 %697 }
 0x2d5   : > { %v733_v0 = vmul.f32 %v732_v60, %v731_v43  ;;  %v700_v7 = vmul.f32 %v699_v5, %v698_v6 }
 0x2d7   : > { %v734_v10 = vsel %vm701_vm14, %v733_v0, 0.0  ;;  %v702_v11 = vsel %vm701_vm14, %v700_v7, 0.0 }
 0x2d8   : > { %v735_v12 = vrot.slane %v734_v10, 4  ;;  %v703_v13 = vrot.slane %v702_v11, 4  ;;  %v795_v16 = vpop.xlane.xlu0 %794  ;;  %v763_v17 = vpop.xlane.xlu1 %762 }
 0x2d9   : > { %v797_v18 = vmul.f32 %v796_v8, %v795_v16  ;;  %v765_v19 = vmul.f32 %v764_v9, %v763_v17 }
 0x2da   : > { %v736_v20 = vadd.f32 %v735_v12, %v734_v10  ;;  %v704_v21 = vadd.f32 %v703_v13, %v702_v11 }
 0x2db   : > { %v798_v24 = vsel %vm701_vm14, %v797_v18, 0.0  ;;  %v766_v25 = vsel %vm701_vm14, %v765_v19, 0.0 }
 0x2dc   : > { %v737_v26 = vrot.slane %v736_v20, 2  ;;  %v705_v27 = vrot.slane %v704_v21, 2  ;;  %v799_v28 = vrot.slane %v798_v24, 4  ;;  %v767_v29 = vrot.slane %v766_v25, 4  ;;  %v859_v30 = vpop.xlane.xlu0 %858  ;;  %v827_v31 = vpop.xlane.xlu1 %826 }
 0x2dd   : > { %v861_v33 = vmul.f32 %v860_v22, %v859_v30  ;;  %v829_v34 = vmul.f32 %v828_v23, %v827_v31 }
 0x2de   : > { %v738_v35 = vadd.f32 %v737_v26, %v736_v20  ;;  %v706_v38 = vadd.f32 %v705_v27, %v704_v21  ;;  %v800_v36 = vadd.f32 %v799_v28, %v798_v24  ;;  %v768_v37 = vadd.f32 %v767_v29, %v766_v25 }
 0x2df   : > { %v862_v47 = vsel %vm701_vm14, %v861_v33, 0.0  ;;  %v830_v48 = vsel %vm701_vm14, %v829_v34, 0.0 }
 0x2e0   : > { %v739_v52 = vrot.slane %v738_v35, 1  ;;  %v707_v53 = vrot.slane %v706_v38, 1  ;;  %v801_v39 = vrot.slane %v800_v36, 2  ;;  %v769_v40 = vrot.slane %v768_v37, 2  ;;  %v923_v54 = vpop.xlane.xlu0 %922  ;;  %v891_v55 = vpop.xlane.xlu1 %890 }
 0x2e1   : > { %v863_v57 = vrot.slane %v862_v47, 4  ;;  %v831_v58 = vrot.slane %v830_v48, 4  ;;  %v925_v44 = vmul.f32 %v924_v41, %v923_v54  ;;  %v893_v45 = vmul.f32 %v892_v42, %v891_v55 }
 0x2e2   : > { %v740_v46 = vadd.f32 %v739_v52, %v738_v35  ;;  %v708_v49 = vadd.f32 %v707_v53, %v706_v38  ;;  %v802_v59 = vadd.f32 %v801_v39, %v800_v36  ;;  %v770_v61 = vadd.f32 %v769_v40, %v768_v37  ;;  %v966_v37 = vld [vmem:[#allocation11] sm:$0x1] }
 0x2e3   : > { %v864_v63 = vadd.f32 %v863_v57, %v862_v47  ;;  %v832_v1 = vadd.f32 %v831_v58, %v830_v48  ;;  %v926_v2 = vsel %vm701_vm14, %v925_v44, 0.0  ;;  %v894_v14 = vsel %vm701_vm14, %v893_v45, 0.0 }
 0x2e4   : > { %v803_v50 = vrot.slane %v802_v59, 1  ;;  %v771_v3 = vrot.slane %v770_v61, 1  ;;  %v927_v15 = vrot.slane %v926_v2, 4  ;;  %v955_v32 = vpop.xlane.xlu1 %954  ;;  %v895_v56 = vrot.slane %v894_v14, 4 }
 0x2e5   : > { %v865_v51 = vrot.slane %v864_v63, 2  ;;  %v833_v4 = vrot.slane %v832_v1, 2  ;;  %v957_v60 = vmul.f32 %v956_v62, %v955_v32  ;;  %v741_v5 = vadd.f32 %v740_v46, %v708_v49 }
 0x2e6   : > { %v772_v43 = vadd.f32 %v771_v3, %v770_v61  ;;  %v928_v6 = vadd.f32 %v927_v15, %v926_v2  ;;  %v896_v8 = vadd.f32 %v895_v56, %v894_v14  ;;  %v804_v10 = vadd.f32 %v803_v50, %v802_v59 }
 0x2e7   : > { %v866_v0 = vadd.f32 %v865_v51, %v864_v63  ;;  %v834_v7 = vadd.f32 %v833_v4, %v832_v1  ;;  %v958_v9 = vsel %vm701_vm14, %v957_v60, 0.0 }
 0x2e8   : > { %v773_v11 = vadd.f32 %v772_v43, %v741_v5  ;;  %v929_v12 = vrot.slane %v928_v6, 2  ;;  %v959_v13 = vrot.slane %v958_v9, 4  ;;  %v897_v18 = vrot.slane %v896_v8, 2 }
 0x2e9   : > { %v867_v16 = vrot.slane %v866_v0, 1  ;;  %v835_v17 = vrot.slane %v834_v7, 1 }
 0x2ea   : > { %v805_v19 = vadd.f32 %v804_v10, %v773_v11  ;;  %v930_v20 = vadd.f32 %v929_v12, %v928_v6  ;;  %v960_v21 = vadd.f32 %v959_v13, %v958_v9  ;;  %v898_v23 = vadd.f32 %v897_v18, %v896_v8 }
 0x2eb   : > { %v836_v22 = vadd.f32 %v835_v17, %v834_v7  ;;  %v868_v25 = vadd.f32 %v867_v16, %v866_v0 }
 0x2ec   : > { %v961_v24 = vrot.slane %v960_v21, 2  ;;  %v931_v27 = vrot.slane %v930_v20, 1  ;;  %v899_v28 = vrot.slane %v898_v23, 1 }
 0x2ed   : > { %v837_v26 = vadd.f32 %v836_v22, %v805_v19 }
 0x2ee   : > { %v962_v29 = vadd.f32 %v961_v24, %v960_v21  ;;  %v900_v31 = vadd.f32 %v899_v28, %v898_v23  ;;  %v932_v34 = vadd.f32 %v931_v27, %v930_v20 }
 0x2ef   : > { %v869_v30 = vadd.f32 %v868_v25, %v837_v26 }
 0x2f0   : > { %v963_v33 = vrot.slane %v962_v29, 1 }
 0x2f1   : > { %v901_v35 = vadd.f32 %v900_v31, %v869_v30 }
 0x2f2   : > { %v964_v38 = vadd.f32 %v963_v33, %v962_v29 }
 0x2f3   : > { %v933_v36 = vadd.f32 %v932_v34, %v901_v35 }
 0x2f5   : > { %v965_v41 = vadd.f32 %v964_v38, %v933_v36 }
 0x2f7   : > { %v967_v42 = vadd.f32 %v966_v37, %v965_v41 }
 0x2f9   : > { %969 = vst.msk [vmem:[%s333_s15] sm:$0x1] %vm968_vm4, %v967_v42 }
 0x2fa   : > { %1459 = shalt.err (!%p1456_p9)
}
 0x2fb   : > { %s1460_s9 = scalar_lea.hbm %s1977_s25, 16  ;;  %s1464_s29 = scalar_lea.hbm %s2027_s6, 32 }
 0x2fc   : > { %p1461_p6 = scmp.ne.s32.totalorder %s1977_s25, %s1460_s9  ;;  %p1465_p8 = scmp.lt.u32.totalorder %s1977_s25, %s2027_s6 }
 0x2fd   : > { %p1466_p10 = scmp.lt.u32.totalorder %s1464_s29, %s1460_s9  ;;  %p1468_p11 = scmp.lt.u32.totalorder %s1460_s9, %s1977_s25 }
 0x2fe   : > { %p1462_p0 = pnand %p1461_p6, %p2046_p13 }
 0x2ff   : > { %p1467_p12 = por %p1466_p10, %p1465_p8 }
 0x300   : > { %p1463_p2 = pneg %p1462_p0 }
 0x301   : > { %p1469_p5 = por %p1468_p11, %p1467_p12 }
 0x303   : > { %p1470_p7 = pnand %p1469_p5, %p1463_p2 }
 0x305   : > { %1473 = shalt.err (!%p1470_p7)
}
 0x306   : > { %1181 = dma.vmem_to_hbm [thread:$0]  (%p2046_p13), %s1979_s30, 16, %s1977_s25, %s971_s28  }
 0x307 PF: > { %s995_s15 = sand.u32 1, %s1512_s21   ;;  %p2047_p4 = scmp.ne.s32.totalorder %s2037_s16, 0 }
 0x308   : > { %p2048_p1 = scmp.ge.s32.totalorder %s1524_s24, 2  ;;  %s996_s12 = scalar_lea.sflag [#allocation5], %s995_s15 }
 0x30a   : > { %p1204_p3 = pnand %p2048_p1, %p2047_p4 }
 0x30c   : > { %1507 = dma.done.wait (!%p1204_p3), %s996_s12, 16  }
 0x30d   : > { %1509 = vsyncadd (!%p1204_p3), %s996_s12, 4294967280  ;;  %p22_p9 = scmp.ge.s32.totalorder %s1735_s11, 4   ;;  %s2049_s21 = smov %s1516_s22 }
 0x30e   : > { %s2050_s22 = smov %s1520_s23  ;;  %s2051_s23 = smov %s1747_s13 }
 0x30f   : > { %s2052_s24 = smov %s1735_s11  ;;  %24 = sbr.rel (!%p22_p9) target bundleno = 8 (0x8), region = 109 }
 0x316   :  { %1000 = vsyncpa [#allocation4], 1 }
 0x317   :  { %1002 = vsyncpa [#allocation4 + $0x1], 1 }
 0x318   :  { %1003 = vsyncpa [#allocation7], 1 }
 0x319   :  { %1004 = vsyncpa [#allocation10], 1 }
 0x31a   :  { %1005 = vsyncpa [#allocation13], 1 }
 0x31b   :  { %1006 = vsyncpa [#allocation5], 1 }
 0x31c   :  { %1008 = vsyncpa [#allocation5 + $0x1], 1 }

</bundles_post_ra>
